<compile_context>
chip_gen: v7x
topology: tpu7x:2x2x1
jax: 0.10.0
libtpu: 0.0.40
codegen_flags: <defaults>
</compile_context>

<pallas_src>
import jax
import jax.numpy as jnp
from jax import lax
from jax.experimental import pallas as pl
from jax.experimental.pallas import tpu as pltpu

_VMEM = pl.BlockSpec(memory_space=pltpu.MemorySpace.VMEM)


# ----------------------------------------------------------------------------
# Fused forward kernel
# ----------------------------------------------------------------------------
def _matchingnet_kernel(
    x_ref, wconv_ref, bconv_ref,
    wih_f_ref, whh_f_ref, bf_ref,
    wih_b_ref, whh_b_ref, bb_ref,
    wih_q_ref, wih_r_ref, whh_c_ref, bc_ref,
    onehot_ref,
    o_ref,
    emb_ref,
):
    t_len = emb_ref.shape[0]          # number of support samples (sequence len)
    d = bconv_ref.shape[1]            # feature / hidden size

    # ---- backbone: one bf16 matmul over [support; query] stacked + ReLU ----
    feats = jnp.maximum(
        jnp.dot(x_ref[...], wconv_ref[...], preferred_element_type=jnp.float32)
        + bconv_ref[...],
        0.0,
    )                                              # [T+Nq, D] f32
    sup_feat = feats[:t_len]                       # [T, D]
    q_feat = feats[t_len:]                         # [Nq, D]

    # ---- sup_LSTM: bidirectional LSTM, both directions in one loop --------
    # Input-to-hidden projections (+ bias) hoisted out of the serial loop.
    sup_bf = sup_feat.astype(jnp.bfloat16)
    proj_f = (jnp.dot(sup_bf, wih_f_ref[...], preferred_element_type=jnp.float32)
              + bf_ref[...])                       # [T, 4D]
    proj_b = (jnp.dot(sup_bf, wih_b_ref[...], preferred_element_type=jnp.float32)
              + bb_ref[...])                       # [T, 4D]
    whh_f = whh_f_ref[...]                         # [D, 4D] bf16 (hoisted reads)
    whh_b = whh_b_ref[...]

    emb_ref[...] = sup_feat                        # residual base of embedding

    h = jnp.zeros((2, d), jnp.float32)             # row0 = fwd, row1 = bwd
    c = jnp.zeros((2, d), jnp.float32)
    for t in range(t_len):                         # static unroll (T is tiny)
        tb = t_len - 1 - t
        h_bf = h.astype(jnp.bfloat16)
        g_f = proj_f[t:t + 1] + jnp.dot(h_bf[0:1], whh_f,
                                        preferred_element_type=jnp.float32)
        g_b = proj_b[tb:tb + 1] + jnp.dot(h_bf[1:2], whh_b,
                                          preferred_element_type=jnp.float32)
        g = jnp.concatenate([g_f, g_b], axis=0)    # [2, 4D], gate order i|f|g|o
        i_g = jax.nn.sigmoid(g[:, 0:d])
        f_g = jax.nn.sigmoid(g[:, d:2 * d])
        g_g = jnp.tanh(g[:, 2 * d:3 * d])
        o_g = jax.nn.sigmoid(g[:, 3 * d:4 * d])
        c = f_g * c + i_g * g_g
        h = o_g * jnp.tanh(c)
        # per-timestep row stores: fwd output -> row t, bwd output -> row T-1-t
        emb_ref[t:t + 1, :] = emb_ref[t:t + 1, :] + h[0:1, :]
        emb_ref[tb:tb + 1, :] = emb_ref[tb:tb + 1, :] + h[1:2, :]

    sup_emb = emb_ref[...]                         # [T, D] f32
    sup_emb_bf = sup_emb.astype(jnp.bfloat16)

    # ---- query_LSTM: attention LSTMCell loop -------------------------------
    # Loop-invariant q @ Wih_q (+ bias) computed once.
    base = (jnp.dot(q_feat.astype(jnp.bfloat16), wih_q_ref[...],
                    preferred_element_type=jnp.float32) + bc_ref[...])  # [Nq, 4D]
    wih_r = wih_r_ref[...]
    whh_c = whh_c_ref[...]
    dn = (((1,), (1,)), ((), ()))                  # contract last dims: A @ B.T

    h_q = q_feat                                   # initial hidden = query feats
    c_q = jnp.zeros_like(q_feat)
    for _ in range(t_len):
        scores = lax.dot_general(h_q.astype(jnp.bfloat16), sup_emb_bf, dn,
                                 preferred_element_type=jnp.float32)    # [Nq, T]
        scores = scores - jnp.max(scores, axis=1, keepdims=True)
        e = jnp.exp(scores)
        att = e * pl.reciprocal(jnp.sum(e, axis=1, keepdims=True), approx=True)
        read = jnp.dot(att.astype(jnp.bfloat16), sup_emb_bf,
                       preferred_element_type=jnp.float32)              # [Nq, D]
        g = (base
             + jnp.dot(read.astype(jnp.bfloat16), wih_r,
                       preferred_element_type=jnp.float32)
             + jnp.dot(h_q.astype(jnp.bfloat16), whh_c,
                       preferred_element_type=jnp.float32))             # [Nq, 4D]
        i_g = jax.nn.sigmoid(g[:, 0:d])
        f_g = jax.nn.sigmoid(g[:, d:2 * d])
        g_g = jnp.tanh(g[:, 2 * d:3 * d])
        o_g = jax.nn.sigmoid(g[:, 3 * d:4 * d])
        c_q = f_g * c_q + i_g * g_g
        h_q = o_g * jnp.tanh(c_q) + q_feat         # residual add, as in module

    # ---- cosine similarity + one-hot aggregation (f32) ---------------------
    # F.normalize semantics: x / max(||x||, 1e-12)
    inv_q = pl.reciprocal(
        jnp.maximum(jnp.sqrt(jnp.sum(h_q * h_q, axis=1, keepdims=True)), 1e-12),
        approx=True)
    inv_s = pl.reciprocal(
        jnp.maximum(jnp.sqrt(jnp.sum(sup_emb * sup_emb, axis=1, keepdims=True)),
                    1e-12),
        approx=True)
    cos = lax.dot_general(h_q * inv_q, sup_emb * inv_s, dn,
                          preferred_element_type=jnp.float32)           # [Nq, T]
    o_ref[...] = jnp.dot(cos, onehot_ref[...],
                         preferred_element_type=jnp.float32).astype(o_ref.dtype)


# ----------------------------------------------------------------------------
# Glue: weight packing + single pallas_call
# ----------------------------------------------------------------------------
def _pack_w(w):
    # per-gate [4, Din, D] (i, f, g, o) -> lane-dense packed [Din, 4*D], bf16
    return (jnp.transpose(w, (1, 0, 2))
            .reshape(w.shape[1], 4 * w.shape[2]).astype(jnp.bfloat16))


def _pack_b(b):
    # per-gate [4, 1, D] -> [1, 4*D], f32 (bias / gate math stays f32)
    return jnp.transpose(b, (1, 0, 2)).reshape(1, 4 * b.shape[2]).astype(jnp.float32)


def matching_net_forward(params, support_data, query_data, support_label):
    t_len = support_data.shape[0]
    nq = query_data.shape[0]
    d = params["w_conv"].shape[1]

    # Stack support + query so the backbone matmul / w_conv DMA happen once.
    x_flat = jnp.concatenate(
        [support_data.reshape(t_len, -1), query_data.reshape(nq, -1)], axis=0
    ).astype(jnp.bfloat16)
    onehot = jax.nn.one_hot(support_label, 5, dtype=jnp.float32)  # glue

    kernel = pl.pallas_call(
        _matchingnet_kernel,
        in_specs=[_VMEM] * 14,
        out_specs=_VMEM,
        out_shape=jax.ShapeDtypeStruct((nq, 5), jnp.float32),
        scratch_shapes=[pltpu.VMEM((t_len, d), jnp.float32)],  # support embedding
    )
    # TODO(synk): at production batch sizes add a 'parallel' grid axis over
    # episodes/queries (uses both v7x TensorCores); not worth it at Nq=8.
    return kernel(
        x_flat,
        params["w_conv"].astype(jnp.bfloat16),
        params["b_conv"],
        _pack_w(params["wih_f"]), _pack_w(params["whh_f"]), _pack_b(params["b_f"]),
        _pack_w(params["wih_b"]), _pack_w(params["whh_b"]), _pack_b(params["b_b"]),
        _pack_w(params["wih_q"]), _pack_w(params["wih_r"]),
        _pack_w(params["whh_c"]), _pack_b(params["b_c"]),
        onehot,
    )


if __name__ == "__main__":
    key = jax.random.PRNGKey(0)
    C, S, D = 4, 16, 32            # channels, spatial, feature == hidden size
    N_SUP, N_QRY = 5, 8            # 5-way support, 8 queries
    ks = jax.random.split(key, 16)
    sc = 0.1
    params = {
        "w_conv": jax.random.normal(ks[0], (C * S * S, D), jnp.float32) * sc,
        "b_conv": jax.random.normal(ks[1], (1, D), jnp.float32) * sc,
        # bi-LSTM (forward / backward directions), per-gate order [i, f, g, o];
        # biases are (b_ih + b_hh)
        "wih_f": jax.random.normal(ks[2], (4, D, D), jnp.float32) * sc,
        "whh_f": jax.random.normal(ks[3], (4, D, D), jnp.float32) * sc,
        "b_f":   jax.random.normal(ks[4], (4, 1, D), jnp.float32) * sc,
        "wih_b": jax.random.normal(ks[5], (4, D, D), jnp.float32) * sc,
        "whh_b": jax.random.normal(ks[6], (4, D, D), jnp.float32) * sc,
        "b_b":   jax.random.normal(ks[7], (4, 1, D), jnp.float32) * sc,
        # attention LSTMCell, input = concat(query, readout) -> two D-blocks
        "wih_q": jax.random.normal(ks[8], (4, D, D), jnp.float32) * sc,
        "wih_r": jax.random.normal(ks[9], (4, D, D), jnp.float32) * sc,
        "whh_c": jax.random.normal(ks[10], (4, D, D), jnp.float32) * sc,
        "b_c":   jax.random.normal(ks[11], (4, 1, D), jnp.float32) * sc,
    }
    support_data = jax.random.normal(ks[12], (N_SUP, C, S, S), jnp.float32)
    query_data = jax.random.normal(ks[13], (N_QRY, C, S, S), jnp.float32)
    support_label = jnp.arange(N_SUP, dtype=jnp.int32)

    fwd = jax.jit(matching_net_forward)
    prob = fwd(params, support_data, query_data, support_label)
    jax.block_until_ready(prob)
    assert prob.shape == (N_QRY, 5) and prob.dtype == jnp.float32
    assert bool(jnp.all(jnp.isfinite(prob)))
    print("KERNEL_OK")
</pallas_src>

<mosaic_0001>
module attributes {stable_mosaic.version = 11 : i64} {
  func.func @_matchingnet_kernel(%arg0: memref<13x1024xbf16, #tpu.memory_space<vmem>>, %arg1: memref<1024x32xbf16, #tpu.memory_space<vmem>>, %arg2: memref<1x32xf32, #tpu.memory_space<vmem>>, %arg3: memref<32x128xbf16, #tpu.memory_space<vmem>>, %arg4: memref<32x128xbf16, #tpu.memory_space<vmem>>, %arg5: memref<1x128xf32, #tpu.memory_space<vmem>>, %arg6: memref<32x128xbf16, #tpu.memory_space<vmem>>, %arg7: memref<32x128xbf16, #tpu.memory_space<vmem>>, %arg8: memref<1x128xf32, #tpu.memory_space<vmem>>, %arg9: memref<32x128xbf16, #tpu.memory_space<vmem>>, %arg10: memref<32x128xbf16, #tpu.memory_space<vmem>>, %arg11: memref<32x128xbf16, #tpu.memory_space<vmem>>, %arg12: memref<1x128xf32, #tpu.memory_space<vmem>>, %arg13: memref<5x5xf32, #tpu.memory_space<vmem>>, %arg14: memref<8x5xf32, #tpu.memory_space<vmem>>, %arg15: memref<5x32xf32, #tpu.memory_space<vmem>>) attributes {dimension_semantics = [], scalar_prefetch = 0 : i64, scratch_operands = 1 : i64, tpu.core_type = #tpu.core_type<tc>} {
    %c0 = arith.constant 0 : index
    %c0_0 = arith.constant 0 : index
    %0 = vector.load %arg0[%c0, %c0_0] : memref<13x1024xbf16, #tpu.memory_space<vmem>>, vector<13x1024xbf16>
    %c0_1 = arith.constant 0 : index
    %c0_2 = arith.constant 0 : index
    %1 = vector.load %arg1[%c0_1, %c0_2] : memref<1024x32xbf16, #tpu.memory_space<vmem>>, vector<1024x32xbf16>
    %cst = arith.constant dense<0.000000e+00> : vector<13x32xf32>
    %2 = tpu.matmul %0, %1, %cst {dimension_numbers = #tpu.dot_dimension_numbers<[1], [0], [0], [1], [0, 0, 1, 1], [], []>} : vector<13x1024xbf16>, vector<1024x32xbf16>, vector<13x32xf32> -> vector<13x32xf32>
    %c0_3 = arith.constant 0 : index
    %c0_4 = arith.constant 0 : index
    %3 = vector.load %arg2[%c0_3, %c0_4] : memref<1x32xf32, #tpu.memory_space<vmem>>, vector<1x32xf32>
    %4 = vector.broadcast %3 : vector<1x32xf32> to vector<13x32xf32>
    %5 = arith.addf %2, %4 : vector<13x32xf32>
    %cst_5 = arith.constant 0.000000e+00 : f32
    %6 = vector.broadcast %cst_5 : f32 to vector<13x32xf32>
    %7 = arith.maximumf %5, %6 : vector<13x32xf32>
    %8 = vector.extract_strided_slice %7 {offsets = [0, 0], sizes = [5, 32], strides = [1, 1]} : vector<13x32xf32> to vector<5x32xf32>
    %9 = vector.extract_strided_slice %7 {offsets = [5, 0], sizes = [8, 32], strides = [1, 1]} : vector<13x32xf32> to vector<8x32xf32>
    %10 = arith.truncf %8 : vector<5x32xf32> to vector<5x32xbf16>
    %c0_6 = arith.constant 0 : index
    %c0_7 = arith.constant 0 : index
    %11 = vector.load %arg3[%c0_6, %c0_7] : memref<32x128xbf16, #tpu.memory_space<vmem>>, vector<32x128xbf16>
    %cst_8 = arith.constant dense<0.000000e+00> : vector<5x128xf32>
    %12 = tpu.matmul %10, %11, %cst_8 {dimension_numbers = #tpu.dot_dimension_numbers<[1], [0], [0], [1], [0, 0, 1, 1], [], []>} : vector<5x32xbf16>, vector<32x128xbf16>, vector<5x128xf32> -> vector<5x128xf32>
    %c0_9 = arith.constant 0 : index
    %c0_10 = arith.constant 0 : index
    %13 = vector.load %arg5[%c0_9, %c0_10] : memref<1x128xf32, #tpu.memory_space<vmem>>, vector<1x128xf32>
    %14 = vector.broadcast %13 : vector<1x128xf32> to vector<5x128xf32>
    %15 = arith.addf %12, %14 : vector<5x128xf32>
    %c0_11 = arith.constant 0 : index
    %c0_12 = arith.constant 0 : index
    %16 = vector.load %arg6[%c0_11, %c0_12] : memref<32x128xbf16, #tpu.memory_space<vmem>>, vector<32x128xbf16>
    %cst_13 = arith.constant dense<0.000000e+00> : vector<5x128xf32>
    %17 = tpu.matmul %10, %16, %cst_13 {dimension_numbers = #tpu.dot_dimension_numbers<[1], [0], [0], [1], [0, 0, 1, 1], [], []>} : vector<5x32xbf16>, vector<32x128xbf16>, vector<5x128xf32> -> vector<5x128xf32>
    %c0_14 = arith.constant 0 : index
    %c0_15 = arith.constant 0 : index
    %18 = vector.load %arg8[%c0_14, %c0_15] : memref<1x128xf32, #tpu.memory_space<vmem>>, vector<1x128xf32>
    %19 = vector.broadcast %18 : vector<1x128xf32> to vector<5x128xf32>
    %20 = arith.addf %17, %19 : vector<5x128xf32>
    %c0_16 = arith.constant 0 : index
    %c0_17 = arith.constant 0 : index
    %21 = vector.load %arg4[%c0_16, %c0_17] : memref<32x128xbf16, #tpu.memory_space<vmem>>, vector<32x128xbf16>
    %c0_18 = arith.constant 0 : index
    %c0_19 = arith.constant 0 : index
    %22 = vector.load %arg7[%c0_18, %c0_19] : memref<32x128xbf16, #tpu.memory_space<vmem>>, vector<32x128xbf16>
    %c0_20 = arith.constant 0 : index
    %c0_21 = arith.constant 0 : index
    %23 = vector.load %arg15[%c0_20, %c0_21] : memref<5x32xf32, #tpu.memory_space<vmem>>, vector<5x32xf32>
    tpu.vector_store %arg15[%c0_20, %c0_21], %8 {strides = array<i32>} : memref<5x32xf32, #tpu.memory_space<vmem>>, vector<5x32xf32>,
    %cst_22 = arith.constant 0.000000e+00 : f32
    %24 = vector.broadcast %cst_22 : f32 to vector<2x32xf32>
    %cst_23 = arith.constant 0.000000e+00 : f32
    %25 = vector.broadcast %cst_23 : f32 to vector<2x32xf32>
    %26 = arith.truncf %24 : vector<2x32xf32> to vector<2x32xbf16>
    %27 = vector.extract_strided_slice %15 {offsets = [0, 0], sizes = [1, 128], strides = [1, 1]} : vector<5x128xf32> to vector<1x128xf32>
    %28 = vector.extract_strided_slice %26 {offsets = [0, 0], sizes = [1, 32], strides = [1, 1]} : vector<2x32xbf16> to vector<1x32xbf16>
    %cst_24 = arith.constant dense<0.000000e+00> : vector<1x128xf32>
    %29 = tpu.matmul %28, %21, %cst_24 {dimension_numbers = #tpu.dot_dimension_numbers<[1], [0], [0], [1], [0, 0, 1, 1], [], []>} : vector<1x32xbf16>, vector<32x128xbf16>, vector<1x128xf32> -> vector<1x128xf32>
    %30 = arith.addf %27, %29 : vector<1x128xf32>
    %31 = vector.extract_strided_slice %20 {offsets = [4, 0], sizes = [1, 128], strides = [1, 1]} : vector<5x128xf32> to vector<1x128xf32>
    %32 = vector.extract_strided_slice %26 {offsets = [1, 0], sizes = [1, 32], strides = [1, 1]} : vector<2x32xbf16> to vector<1x32xbf16>
    %cst_25 = arith.constant dense<0.000000e+00> : vector<1x128xf32>
    %33 = tpu.matmul %32, %22, %cst_25 {dimension_numbers = #tpu.dot_dimension_numbers<[1], [0], [0], [1], [0, 0, 1, 1], [], []>} : vector<1x32xbf16>, vector<32x128xbf16>, vector<1x128xf32> -> vector<1x128xf32>
    %34 = arith.addf %31, %33 : vector<1x128xf32>
    %35 = tpu.concatenate %30, %34 in 0 : vector<1x128xf32>, vector<1x128xf32> -> vector<2x128xf32>
    %36 = vector.extract_strided_slice %35 {offsets = [0, 0], sizes = [2, 32], strides = [1, 1]} : vector<2x128xf32> to vector<2x32xf32>
    %37 = arith.negf %36 : vector<2x32xf32>
    %38 = math.exp %37 : vector<2x32xf32>
    %cst_26 = arith.constant 1.000000e+00 : f32
    %39 = vector.broadcast %cst_26 : f32 to vector<2x32xf32>
    %40 = arith.addf %39, %38 : vector<2x32xf32>
    %41 = arith.divf %39, %40 : vector<2x32xf32>
    %42 = vector.extract_strided_slice %35 {offsets = [0, 32], sizes = [2, 32], strides = [1, 1]} : vector<2x128xf32> to vector<2x32xf32>
    %43 = arith.negf %42 : vector<2x32xf32>
    %44 = math.exp %43 : vector<2x32xf32>
    %cst_27 = arith.constant 1.000000e+00 : f32
    %45 = vector.broadcast %cst_27 : f32 to vector<2x32xf32>
    %46 = arith.addf %45, %44 : vector<2x32xf32>
    %47 = arith.divf %45, %46 : vector<2x32xf32>
    %48 = vector.extract_strided_slice %35 {offsets = [0, 64], sizes = [2, 32], strides = [1, 1]} : vector<2x128xf32> to vector<2x32xf32>
    %49 = math.tanh %48 : vector<2x32xf32>
    %50 = vector.extract_strided_slice %35 {offsets = [0, 96], sizes = [2, 32], strides = [1, 1]} : vector<2x128xf32> to vector<2x32xf32>
    %51 = arith.negf %50 : vector<2x32xf32>
    %52 = math.exp %51 : vector<2x32xf32>
    %cst_28 = arith.constant 1.000000e+00 : f32
    %53 = vector.broadcast %cst_28 : f32 to vector<2x32xf32>
    %54 = arith.addf %53, %52 : vector<2x32xf32>
    %55 = arith.divf %53, %54 : vector<2x32xf32>
    %56 = arith.mulf %47, %25 : vector<2x32xf32>
    %57 = arith.mulf %41, %49 : vector<2x32xf32>
    %58 = arith.addf %56, %57 : vector<2x32xf32>
    %59 = math.tanh %58 : vector<2x32xf32>
    %60 = arith.mulf %55, %59 : vector<2x32xf32>
    %c0_29 = arith.constant 0 : index
    %c0_30 = arith.constant 0 : index
    %61 = vector.load %arg15[%c0_29, %c0_30] : memref<5x32xf32, #tpu.memory_space<vmem>>, vector<1x32xf32>
    %62 = vector.extract_strided_slice %60 {offsets = [0, 0], sizes = [1, 32], strides = [1, 1]} : vector<2x32xf32> to vector<1x32xf32>
    %63 = arith.addf %61, %62 : vector<1x32xf32>
    %c0_31 = arith.constant 0 : index
    %c0_32 = arith.constant 0 : index
    %64 = vector.load %arg15[%c0_31, %c0_32] : memref<5x32xf32, #tpu.memory_space<vmem>>, vector<1x32xf32>
    tpu.vector_store %arg15[%c0_31, %c0_32], %63 {strides = array<i32>} : memref<5x32xf32, #tpu.memory_space<vmem>>, vector<1x32xf32>,
    %c4 = arith.constant 4 : index
    %c0_33 = arith.constant 0 : index
    %65 = vector.load %arg15[%c4, %c0_33] : memref<5x32xf32, #tpu.memory_space<vmem>>, vector<1x32xf32>
    %66 = vector.extract_strided_slice %60 {offsets = [1, 0], sizes = [1, 32], strides = [1, 1]} : vector<2x32xf32> to vector<1x32xf32>
    %67 = arith.addf %65, %66 : vector<1x32xf32>
    %c4_34 = arith.constant 4 : index
    %c0_35 = arith.constant 0 : index
    %68 = vector.load %arg15[%c4_34, %c0_35] : memref<5x32xf32, #tpu.memory_space<vmem>>, vector<1x32xf32>
    tpu.vector_store %arg15[%c4_34, %c0_35], %67 {strides = array<i32>} : memref<5x32xf32, #tpu.memory_space<vmem>>, vector<1x32xf32>,
    %69 = arith.truncf %60 : vector<2x32xf32> to vector<2x32xbf16>
    %70 = vector.extract_strided_slice %15 {offsets = [1, 0], sizes = [1, 128], strides = [1, 1]} : vector<5x128xf32> to vector<1x128xf32>
    %71 = vector.extract_strided_slice %69 {offsets = [0, 0], sizes = [1, 32], strides = [1, 1]} : vector<2x32xbf16> to vector<1x32xbf16>
    %cst_36 = arith.constant dense<0.000000e+00> : vector<1x128xf32>
    %72 = tpu.matmul %71, %21, %cst_36 {dimension_numbers = #tpu.dot_dimension_numbers<[1], [0], [0], [1], [0, 0, 1, 1], [], []>} : vector<1x32xbf16>, vector<32x128xbf16>, vector<1x128xf32> -> vector<1x128xf32>
    %73 = arith.addf %70, %72 : vector<1x128xf32>
    %74 = vector.extract_strided_slice %20 {offsets = [3, 0], sizes = [1, 128], strides = [1, 1]} : vector<5x128xf32> to vector<1x128xf32>
    %75 = vector.extract_strided_slice %69 {offsets = [1, 0], sizes = [1, 32], strides = [1, 1]} : vector<2x32xbf16> to vector<1x32xbf16>
    %cst_37 = arith.constant dense<0.000000e+00> : vector<1x128xf32>
    %76 = tpu.matmul %75, %22, %cst_37 {dimension_numbers = #tpu.dot_dimension_numbers<[1], [0], [0], [1], [0, 0, 1, 1], [], []>} : vector<1x32xbf16>, vector<32x128xbf16>, vector<1x128xf32> -> vector<1x128xf32>
    %77 = arith.addf %74, %76 : vector<1x128xf32>
    %78 = tpu.concatenate %73, %77 in 0 : vector<1x128xf32>, vector<1x128xf32> -> vector<2x128xf32>
    %79 = vector.extract_strided_slice %78 {offsets = [0, 0], sizes = [2, 32], strides = [1, 1]} : vector<2x128xf32> to vector<2x32xf32>
    %80 = arith.negf %79 : vector<2x32xf32>
    %81 = math.exp %80 : vector<2x32xf32>
    %cst_38 = arith.constant 1.000000e+00 : f32
    %82 = vector.broadcast %cst_38 : f32 to vector<2x32xf32>
    %83 = arith.addf %82, %81 : vector<2x32xf32>
    %84 = arith.divf %82, %83 : vector<2x32xf32>
    %85 = vector.extract_strided_slice %78 {offsets = [0, 32], sizes = [2, 32], strides = [1, 1]} : vector<2x128xf32> to vector<2x32xf32>
    %86 = arith.negf %85 : vector<2x32xf32>
    %87 = math.exp %86 : vector<2x32xf32>
    %cst_39 = arith.constant 1.000000e+00 : f32
    %88 = vector.broadcast %cst_39 : f32 to vector<2x32xf32>
    %89 = arith.addf %88, %87 : vector<2x32xf32>
    %90 = arith.divf %88, %89 : vector<2x32xf32>
    %91 = vector.extract_strided_slice %78 {offsets = [0, 64], sizes = [2, 32], strides = [1, 1]} : vector<2x128xf32> to vector<2x32xf32>
    %92 = math.tanh %91 : vector<2x32xf32>
    %93 = vector.extract_strided_slice %78 {offsets = [0, 96], sizes = [2, 32], strides = [1, 1]} : vector<2x128xf32> to vector<2x32xf32>
    %94 = arith.negf %93 : vector<2x32xf32>
    %95 = math.exp %94 : vector<2x32xf32>
    %cst_40 = arith.constant 1.000000e+00 : f32
    %96 = vector.broadcast %cst_40 : f32 to vector<2x32xf32>
    %97 = arith.addf %96, %95 : vector<2x32xf32>
    %98 = arith.divf %96, %97 : vector<2x32xf32>
    %99 = arith.mulf %90, %58 : vector<2x32xf32>
    %100 = arith.mulf %84, %92 : vector<2x32xf32>
    %101 = arith.addf %99, %100 : vector<2x32xf32>
    %102 = math.tanh %101 : vector<2x32xf32>
    %103 = arith.mulf %98, %102 : vector<2x32xf32>
    %c1 = arith.constant 1 : index
    %c0_41 = arith.constant 0 : index
    %104 = vector.load %arg15[%c1, %c0_41] : memref<5x32xf32, #tpu.memory_space<vmem>>, vector<1x32xf32>
    %105 = vector.extract_strided_slice %103 {offsets = [0, 0], sizes = [1, 32], strides = [1, 1]} : vector<2x32xf32> to vector<1x32xf32>
    %106 = arith.addf %104, %105 : vector<1x32xf32>
    %c1_42 = arith.constant 1 : index
    %c0_43 = arith.constant 0 : index
    %107 = vector.load %arg15[%c1_42, %c0_43] : memref<5x32xf32, #tpu.memory_space<vmem>>, vector<1x32xf32>
    tpu.vector_store %arg15[%c1_42, %c0_43], %106 {strides = array<i32>} : memref<5x32xf32, #tpu.memory_space<vmem>>, vector<1x32xf32>,
    %c3 = arith.constant 3 : index
    %c0_44 = arith.constant 0 : index
    %108 = vector.load %arg15[%c3, %c0_44] : memref<5x32xf32, #tpu.memory_space<vmem>>, vector<1x32xf32>
    %109 = vector.extract_strided_slice %103 {offsets = [1, 0], sizes = [1, 32], strides = [1, 1]} : vector<2x32xf32> to vector<1x32xf32>
    %110 = arith.addf %108, %109 : vector<1x32xf32>
    %c3_45 = arith.constant 3 : index
    %c0_46 = arith.constant 0 : index
    %111 = vector.load %arg15[%c3_45, %c0_46] : memref<5x32xf32, #tpu.memory_space<vmem>>, vector<1x32xf32>
    tpu.vector_store %arg15[%c3_45, %c0_46], %110 {strides = array<i32>} : memref<5x32xf32, #tpu.memory_space<vmem>>, vector<1x32xf32>,
    %112 = arith.truncf %103 : vector<2x32xf32> to vector<2x32xbf16>
    %113 = vector.extract_strided_slice %15 {offsets = [2, 0], sizes = [1, 128], strides = [1, 1]} : vector<5x128xf32> to vector<1x128xf32>
    %114 = vector.extract_strided_slice %112 {offsets = [0, 0], sizes = [1, 32], strides = [1, 1]} : vector<2x32xbf16> to vector<1x32xbf16>
    %cst_47 = arith.constant dense<0.000000e+00> : vector<1x128xf32>
    %115 = tpu.matmul %114, %21, %cst_47 {dimension_numbers = #tpu.dot_dimension_numbers<[1], [0], [0], [1], [0, 0, 1, 1], [], []>} : vector<1x32xbf16>, vector<32x128xbf16>, vector<1x128xf32> -> vector<1x128xf32>
    %116 = arith.addf %113, %115 : vector<1x128xf32>
    %117 = vector.extract_strided_slice %20 {offsets = [2, 0], sizes = [1, 128], strides = [1, 1]} : vector<5x128xf32> to vector<1x128xf32>
    %118 = vector.extract_strided_slice %112 {offsets = [1, 0], sizes = [1, 32], strides = [1, 1]} : vector<2x32xbf16> to vector<1x32xbf16>
    %cst_48 = arith.constant dense<0.000000e+00> : vector<1x128xf32>
    %119 = tpu.matmul %118, %22, %cst_48 {dimension_numbers = #tpu.dot_dimension_numbers<[1], [0], [0], [1], [0, 0, 1, 1], [], []>} : vector<1x32xbf16>, vector<32x128xbf16>, vector<1x128xf32> -> vector<1x128xf32>
    %120 = arith.addf %117, %119 : vector<1x128xf32>
    %121 = tpu.concatenate %116, %120 in 0 : vector<1x128xf32>, vector<1x128xf32> -> vector<2x128xf32>
    %122 = vector.extract_strided_slice %121 {offsets = [0, 0], sizes = [2, 32], strides = [1, 1]} : vector<2x128xf32> to vector<2x32xf32>
    %123 = arith.negf %122 : vector<2x32xf32>
    %124 = math.exp %123 : vector<2x32xf32>
    %cst_49 = arith.constant 1.000000e+00 : f32
    %125 = vector.broadcast %cst_49 : f32 to vector<2x32xf32>
    %126 = arith.addf %125, %124 : vector<2x32xf32>
    %127 = arith.divf %125, %126 : vector<2x32xf32>
    %128 = vector.extract_strided_slice %121 {offsets = [0, 32], sizes = [2, 32], strides = [1, 1]} : vector<2x128xf32> to vector<2x32xf32>
    %129 = arith.negf %128 : vector<2x32xf32>
    %130 = math.exp %129 : vector<2x32xf32>
    %cst_50 = arith.constant 1.000000e+00 : f32
    %131 = vector.broadcast %cst_50 : f32 to vector<2x32xf32>
    %132 = arith.addf %131, %130 : vector<2x32xf32>
    %133 = arith.divf %131, %132 : vector<2x32xf32>
    %134 = vector.extract_strided_slice %121 {offsets = [0, 64], sizes = [2, 32], strides = [1, 1]} : vector<2x128xf32> to vector<2x32xf32>
    %135 = math.tanh %134 : vector<2x32xf32>
    %136 = vector.extract_strided_slice %121 {offsets = [0, 96], sizes = [2, 32], strides = [1, 1]} : vector<2x128xf32> to vector<2x32xf32>
    %137 = arith.negf %136 : vector<2x32xf32>
    %138 = math.exp %137 : vector<2x32xf32>
    %cst_51 = arith.constant 1.000000e+00 : f32
    %139 = vector.broadcast %cst_51 : f32 to vector<2x32xf32>
    %140 = arith.addf %139, %138 : vector<2x32xf32>
    %141 = arith.divf %139, %140 : vector<2x32xf32>
    %142 = arith.mulf %133, %101 : vector<2x32xf32>
    %143 = arith.mulf %127, %135 : vector<2x32xf32>
    %144 = arith.addf %142, %143 : vector<2x32xf32>
    %145 = math.tanh %144 : vector<2x32xf32>
    %146 = arith.mulf %141, %145 : vector<2x32xf32>
    %c2 = arith.constant 2 : index
    %c0_52 = arith.constant 0 : index
    %147 = vector.load %arg15[%c2, %c0_52] : memref<5x32xf32, #tpu.memory_space<vmem>>, vector<1x32xf32>
    %148 = vector.extract_strided_slice %146 {offsets = [0, 0], sizes = [1, 32], strides = [1, 1]} : vector<2x32xf32> to vector<1x32xf32>
    %149 = arith.addf %147, %148 : vector<1x32xf32>
    %c2_53 = arith.constant 2 : index
    %c0_54 = arith.constant 0 : index
    %150 = vector.load %arg15[%c2_53, %c0_54] : memref<5x32xf32, #tpu.memory_space<vmem>>, vector<1x32xf32>
    tpu.vector_store %arg15[%c2_53, %c0_54], %149 {strides = array<i32>} : memref<5x32xf32, #tpu.memory_space<vmem>>, vector<1x32xf32>,
    %c2_55 = arith.constant 2 : index
    %c0_56 = arith.constant 0 : index
    %151 = vector.load %arg15[%c2_55, %c0_56] : memref<5x32xf32, #tpu.memory_space<vmem>>, vector<1x32xf32>
    %152 = vector.extract_strided_slice %146 {offsets = [1, 0], sizes = [1, 32], strides = [1, 1]} : vector<2x32xf32> to vector<1x32xf32>
    %153 = arith.addf %151, %152 : vector<1x32xf32>
    %c2_57 = arith.constant 2 : index
    %c0_58 = arith.constant 0 : index
    %154 = vector.load %arg15[%c2_57, %c0_58] : memref<5x32xf32, #tpu.memory_space<vmem>>, vector<1x32xf32>
    tpu.vector_store %arg15[%c2_57, %c0_58], %153 {strides = array<i32>} : memref<5x32xf32, #tpu.memory_space<vmem>>, vector<1x32xf32>,
    %155 = arith.truncf %146 : vector<2x32xf32> to vector<2x32xbf16>
    %156 = vector.extract_strided_slice %15 {offsets = [3, 0], sizes = [1, 128], strides = [1, 1]} : vector<5x128xf32> to vector<1x128xf32>
    %157 = vector.extract_strided_slice %155 {offsets = [0, 0], sizes = [1, 32], strides = [1, 1]} : vector<2x32xbf16> to vector<1x32xbf16>
    %cst_59 = arith.constant dense<0.000000e+00> : vector<1x128xf32>
    %158 = tpu.matmul %157, %21, %cst_59 {dimension_numbers = #tpu.dot_dimension_numbers<[1], [0], [0], [1], [0, 0, 1, 1], [], []>} : vector<1x32xbf16>, vector<32x128xbf16>, vector<1x128xf32> -> vector<1x128xf32>
    %159 = arith.addf %156, %158 : vector<1x128xf32>
    %160 = vector.extract_strided_slice %20 {offsets = [1, 0], sizes = [1, 128], strides = [1, 1]} : vector<5x128xf32> to vector<1x128xf32>
    %161 = vector.extract_strided_slice %155 {offsets = [1, 0], sizes = [1, 32], strides = [1, 1]} : vector<2x32xbf16> to vector<1x32xbf16>
    %cst_60 = arith.constant dense<0.000000e+00> : vector<1x128xf32>
    %162 = tpu.matmul %161, %22, %cst_60 {dimension_numbers = #tpu.dot_dimension_numbers<[1], [0], [0], [1], [0, 0, 1, 1], [], []>} : vector<1x32xbf16>, vector<32x128xbf16>, vector<1x128xf32> -> vector<1x128xf32>
    %163 = arith.addf %160, %162 : vector<1x128xf32>
    %164 = tpu.concatenate %159, %163 in 0 : vector<1x128xf32>, vector<1x128xf32> -> vector<2x128xf32>
    %165 = vector.extract_strided_slice %164 {offsets = [0, 0], sizes = [2, 32], strides = [1, 1]} : vector<2x128xf32> to vector<2x32xf32>
    %166 = arith.negf %165 : vector<2x32xf32>
    %167 = math.exp %166 : vector<2x32xf32>
    %cst_61 = arith.constant 1.000000e+00 : f32
    %168 = vector.broadcast %cst_61 : f32 to vector<2x32xf32>
    %169 = arith.addf %168, %167 : vector<2x32xf32>
    %170 = arith.divf %168, %169 : vector<2x32xf32>
    %171 = vector.extract_strided_slice %164 {offsets = [0, 32], sizes = [2, 32], strides = [1, 1]} : vector<2x128xf32> to vector<2x32xf32>
    %172 = arith.negf %171 : vector<2x32xf32>
    %173 = math.exp %172 : vector<2x32xf32>
    %cst_62 = arith.constant 1.000000e+00 : f32
    %174 = vector.broadcast %cst_62 : f32 to vector<2x32xf32>
    %175 = arith.addf %174, %173 : vector<2x32xf32>
    %176 = arith.divf %174, %175 : vector<2x32xf32>
    %177 = vector.extract_strided_slice %164 {offsets = [0, 64], sizes = [2, 32], strides = [1, 1]} : vector<2x128xf32> to vector<2x32xf32>
    %178 = math.tanh %177 : vector<2x32xf32>
    %179 = vector.extract_strided_slice %164 {offsets = [0, 96], sizes = [2, 32], strides = [1, 1]} : vector<2x128xf32> to vector<2x32xf32>
    %180 = arith.negf %179 : vector<2x32xf32>
    %181 = math.exp %180 : vector<2x32xf32>
    %cst_63 = arith.constant 1.000000e+00 : f32
    %182 = vector.broadcast %cst_63 : f32 to vector<2x32xf32>
    %183 = arith.addf %182, %181 : vector<2x32xf32>
    %184 = arith.divf %182, %183 : vector<2x32xf32>
    %185 = arith.mulf %176, %144 : vector<2x32xf32>
    %186 = arith.mulf %170, %178 : vector<2x32xf32>
    %187 = arith.addf %185, %186 : vector<2x32xf32>
    %188 = math.tanh %187 : vector<2x32xf32>
    %189 = arith.mulf %184, %188 : vector<2x32xf32>
    %c3_64 = arith.constant 3 : index
    %c0_65 = arith.constant 0 : index
    %190 = vector.load %arg15[%c3_64, %c0_65] : memref<5x32xf32, #tpu.memory_space<vmem>>, vector<1x32xf32>
    %191 = vector.extract_strided_slice %189 {offsets = [0, 0], sizes = [1, 32], strides = [1, 1]} : vector<2x32xf32> to vector<1x32xf32>
    %192 = arith.addf %190, %191 : vector<1x32xf32>
    %c3_66 = arith.constant 3 : index
    %c0_67 = arith.constant 0 : index
    %193 = vector.load %arg15[%c3_66, %c0_67] : memref<5x32xf32, #tpu.memory_space<vmem>>, vector<1x32xf32>
    tpu.vector_store %arg15[%c3_66, %c0_67], %192 {strides = array<i32>} : memref<5x32xf32, #tpu.memory_space<vmem>>, vector<1x32xf32>,
    %c1_68 = arith.constant 1 : index
    %c0_69 = arith.constant 0 : index
    %194 = vector.load %arg15[%c1_68, %c0_69] : memref<5x32xf32, #tpu.memory_space<vmem>>, vector<1x32xf32>
    %195 = vector.extract_strided_slice %189 {offsets = [1, 0], sizes = [1, 32], strides = [1, 1]} : vector<2x32xf32> to vector<1x32xf32>
    %196 = arith.addf %194, %195 : vector<1x32xf32>
    %c1_70 = arith.constant 1 : index
    %c0_71 = arith.constant 0 : index
    %197 = vector.load %arg15[%c1_70, %c0_71] : memref<5x32xf32, #tpu.memory_space<vmem>>, vector<1x32xf32>
    tpu.vector_store %arg15[%c1_70, %c0_71], %196 {strides = array<i32>} : memref<5x32xf32, #tpu.memory_space<vmem>>, vector<1x32xf32>,
    %198 = arith.truncf %189 : vector<2x32xf32> to vector<2x32xbf16>
    %199 = vector.extract_strided_slice %15 {offsets = [4, 0], sizes = [1, 128], strides = [1, 1]} : vector<5x128xf32> to vector<1x128xf32>
    %200 = vector.extract_strided_slice %198 {offsets = [0, 0], sizes = [1, 32], strides = [1, 1]} : vector<2x32xbf16> to vector<1x32xbf16>
    %cst_72 = arith.constant dense<0.000000e+00> : vector<1x128xf32>
    %201 = tpu.matmul %200, %21, %cst_72 {dimension_numbers = #tpu.dot_dimension_numbers<[1], [0], [0], [1], [0, 0, 1, 1], [], []>} : vector<1x32xbf16>, vector<32x128xbf16>, vector<1x128xf32> -> vector<1x128xf32>
    %202 = arith.addf %199, %201 : vector<1x128xf32>
    %203 = vector.extract_strided_slice %20 {offsets = [0, 0], sizes = [1, 128], strides = [1, 1]} : vector<5x128xf32> to vector<1x128xf32>
    %204 = vector.extract_strided_slice %198 {offsets = [1, 0], sizes = [1, 32], strides = [1, 1]} : vector<2x32xbf16> to vector<1x32xbf16>
    %cst_73 = arith.constant dense<0.000000e+00> : vector<1x128xf32>
    %205 = tpu.matmul %204, %22, %cst_73 {dimension_numbers = #tpu.dot_dimension_numbers<[1], [0], [0], [1], [0, 0, 1, 1], [], []>} : vector<1x32xbf16>, vector<32x128xbf16>, vector<1x128xf32> -> vector<1x128xf32>
    %206 = arith.addf %203, %205 : vector<1x128xf32>
    %207 = tpu.concatenate %202, %206 in 0 : vector<1x128xf32>, vector<1x128xf32> -> vector<2x128xf32>
    %208 = vector.extract_strided_slice %207 {offsets = [0, 0], sizes = [2, 32], strides = [1, 1]} : vector<2x128xf32> to vector<2x32xf32>
    %209 = arith.negf %208 : vector<2x32xf32>
    %210 = math.exp %209 : vector<2x32xf32>
    %cst_74 = arith.constant 1.000000e+00 : f32
    %211 = vector.broadcast %cst_74 : f32 to vector<2x32xf32>
    %212 = arith.addf %211, %210 : vector<2x32xf32>
    %213 = arith.divf %211, %212 : vector<2x32xf32>
    %214 = vector.extract_strided_slice %207 {offsets = [0, 32], sizes = [2, 32], strides = [1, 1]} : vector<2x128xf32> to vector<2x32xf32>
    %215 = arith.negf %214 : vector<2x32xf32>
    %216 = math.exp %215 : vector<2x32xf32>
    %cst_75 = arith.constant 1.000000e+00 : f32
    %217 = vector.broadcast %cst_75 : f32 to vector<2x32xf32>
    %218 = arith.addf %217, %216 : vector<2x32xf32>
    %219 = arith.divf %217, %218 : vector<2x32xf32>
    %220 = vector.extract_strided_slice %207 {offsets = [0, 64], sizes = [2, 32], strides = [1, 1]} : vector<2x128xf32> to vector<2x32xf32>
    %221 = math.tanh %220 : vector<2x32xf32>
    %222 = vector.extract_strided_slice %207 {offsets = [0, 96], sizes = [2, 32], strides = [1, 1]} : vector<2x128xf32> to vector<2x32xf32>
    %223 = arith.negf %222 : vector<2x32xf32>
    %224 = math.exp %223 : vector<2x32xf32>
    %cst_76 = arith.constant 1.000000e+00 : f32
    %225 = vector.broadcast %cst_76 : f32 to vector<2x32xf32>
    %226 = arith.addf %225, %224 : vector<2x32xf32>
    %227 = arith.divf %225, %226 : vector<2x32xf32>
    %228 = arith.mulf %219, %187 : vector<2x32xf32>
    %229 = arith.mulf %213, %221 : vector<2x32xf32>
    %230 = arith.addf %228, %229 : vector<2x32xf32>
    %231 = math.tanh %230 : vector<2x32xf32>
    %232 = arith.mulf %227, %231 : vector<2x32xf32>
    %c4_77 = arith.constant 4 : index
    %c0_78 = arith.constant 0 : index
    %233 = vector.load %arg15[%c4_77, %c0_78] : memref<5x32xf32, #tpu.memory_space<vmem>>, vector<1x32xf32>
    %234 = vector.extract_strided_slice %232 {offsets = [0, 0], sizes = [1, 32], strides = [1, 1]} : vector<2x32xf32> to vector<1x32xf32>
    %235 = arith.addf %233, %234 : vector<1x32xf32>
    %c4_79 = arith.constant 4 : index
    %c0_80 = arith.constant 0 : index
    %236 = vector.load %arg15[%c4_79, %c0_80] : memref<5x32xf32, #tpu.memory_space<vmem>>, vector<1x32xf32>
    tpu.vector_store %arg15[%c4_79, %c0_80], %235 {strides = array<i32>} : memref<5x32xf32, #tpu.memory_space<vmem>>, vector<1x32xf32>,
    %c0_81 = arith.constant 0 : index
    %c0_82 = arith.constant 0 : index
    %237 = vector.load %arg15[%c0_81, %c0_82] : memref<5x32xf32, #tpu.memory_space<vmem>>, vector<1x32xf32>
    %238 = vector.extract_strided_slice %232 {offsets = [1, 0], sizes = [1, 32], strides = [1, 1]} : vector<2x32xf32> to vector<1x32xf32>
    %239 = arith.addf %237, %238 : vector<1x32xf32>
    %c0_83 = arith.constant 0 : index
    %c0_84 = arith.constant 0 : index
    %240 = vector.load %arg15[%c0_83, %c0_84] : memref<5x32xf32, #tpu.memory_space<vmem>>, vector<1x32xf32>
    tpu.vector_store %arg15[%c0_83, %c0_84], %239 {strides = array<i32>} : memref<5x32xf32, #tpu.memory_space<vmem>>, vector<1x32xf32>,
    %c0_85 = arith.constant 0 : index
    %c0_86 = arith.constant 0 : index
    %241 = vector.load %arg15[%c0_85, %c0_86] : memref<5x32xf32, #tpu.memory_space<vmem>>, vector<5x32xf32>
    %242 = arith.truncf %241 : vector<5x32xf32> to vector<5x32xbf16>
    %243 = arith.truncf %9 : vector<8x32xf32> to vector<8x32xbf16>
    %c0_87 = arith.constant 0 : index
    %c0_88 = arith.constant 0 : index
    %244 = vector.load %arg9[%c0_87, %c0_88] : memref<32x128xbf16, #tpu.memory_space<vmem>>, vector<32x128xbf16>
    %cst_89 = arith.constant dense<0.000000e+00> : vector<8x128xf32>
    %245 = tpu.matmul %243, %244, %cst_89 {dimension_numbers = #tpu.dot_dimension_numbers<[1], [0], [0], [1], [0, 0, 1, 1], [], []>} : vector<8x32xbf16>, vector<32x128xbf16>, vector<8x128xf32> -> vector<8x128xf32>
    %c0_90 = arith.constant 0 : index
    %c0_91 = arith.constant 0 : index
    %246 = vector.load %arg12[%c0_90, %c0_91] : memref<1x128xf32, #tpu.memory_space<vmem>>, vector<1x128xf32>
    %247 = vector.broadcast %246 : vector<1x128xf32> to vector<8x128xf32>
    %248 = arith.addf %245, %247 : vector<8x128xf32>
    %c0_92 = arith.constant 0 : index
    %c0_93 = arith.constant 0 : index
    %249 = vector.load %arg10[%c0_92, %c0_93] : memref<32x128xbf16, #tpu.memory_space<vmem>>, vector<32x128xbf16>
    %c0_94 = arith.constant 0 : index
    %c0_95 = arith.constant 0 : index
    %250 = vector.load %arg11[%c0_94, %c0_95] : memref<32x128xbf16, #tpu.memory_space<vmem>>, vector<32x128xbf16>
    %cst_96 = arith.constant 0.000000e+00 : f32
    %251 = vector.broadcast %cst_96 : f32 to vector<8x32xf32>
    %252 = arith.truncf %9 : vector<8x32xf32> to vector<8x32xbf16>
    %cst_97 = arith.constant dense<0.000000e+00> : vector<8x5xf32>
    %253 = tpu.matmul %252, %242, %cst_97 {dimension_numbers = #tpu.dot_dimension_numbers<[1], [1], [0], [0], [0, 0, 1, 0], [], []>} : vector<8x32xbf16>, vector<5x32xbf16>, vector<8x5xf32> -> vector<8x5xf32>
    %cst_98 = arith.constant dense<0xFF800000> : vector<8xf32>
    %254 = vector.multi_reduction <maximumf>, %253, %cst_98 [1] : vector<8x5xf32> to vector<8xf32>
    %255 = vector.shape_cast %254 : vector<8xf32> to vector<8x1xf32>
    %256 = vector.broadcast %255 : vector<8x1xf32> to vector<8x5xf32>
    %257 = arith.subf %253, %256 : vector<8x5xf32>
    %258 = math.exp %257 : vector<8x5xf32>
    %cst_99 = arith.constant dense<0.000000e+00> : vector<8xf32>
    %259 = vector.multi_reduction <add>, %258, %cst_99 [1] : vector<8x5xf32> to vector<8xf32>
    %260 = vector.shape_cast %259 : vector<8xf32> to vector<8x1xf32>
    %261 = tpu.reciprocal %260 {approx = true} : vector<8x1xf32> -> vector<8x1xf32>
    %262 = vector.broadcast %261 : vector<8x1xf32> to vector<8x5xf32>
    %263 = arith.mulf %258, %262 : vector<8x5xf32>
    %264 = arith.truncf %263 : vector<8x5xf32> to vector<8x5xbf16>
    %cst_100 = arith.constant dense<0.000000e+00> : vector<8x32xf32>
    %265 = tpu.matmul %264, %242, %cst_100 {dimension_numbers = #tpu.dot_dimension_numbers<[1], [0], [0], [1], [0, 0, 1, 1], [], []>} : vector<8x5xbf16>, vector<5x32xbf16>, vector<8x32xf32> -> vector<8x32xf32>
    %266 = arith.truncf %265 : vector<8x32xf32> to vector<8x32xbf16>
    %cst_101 = arith.constant dense<0.000000e+00> : vector<8x128xf32>
    %267 = tpu.matmul %266, %249, %cst_101 {dimension_numbers = #tpu.dot_dimension_numbers<[1], [0], [0], [1], [0, 0, 1, 1], [], []>} : vector<8x32xbf16>, vector<32x128xbf16>, vector<8x128xf32> -> vector<8x128xf32>
    %268 = arith.addf %248, %267 : vector<8x128xf32>
    %269 = arith.truncf %9 : vector<8x32xf32> to vector<8x32xbf16>
    %cst_102 = arith.constant dense<0.000000e+00> : vector<8x128xf32>
    %270 = tpu.matmul %269, %250, %cst_102 {dimension_numbers = #tpu.dot_dimension_numbers<[1], [0], [0], [1], [0, 0, 1, 1], [], []>} : vector<8x32xbf16>, vector<32x128xbf16>, vector<8x128xf32> -> vector<8x128xf32>
    %271 = arith.addf %268, %270 : vector<8x128xf32>
    %272 = vector.extract_strided_slice %271 {offsets = [0, 0], sizes = [8, 32], strides = [1, 1]} : vector<8x128xf32> to vector<8x32xf32>
    %273 = arith.negf %272 : vector<8x32xf32>
    %274 = math.exp %273 : vector<8x32xf32>
    %cst_103 = arith.constant 1.000000e+00 : f32
    %275 = vector.broadcast %cst_103 : f32 to vector<8x32xf32>
    %276 = arith.addf %275, %274 : vector<8x32xf32>
    %277 = arith.divf %275, %276 : vector<8x32xf32>
    %278 = vector.extract_strided_slice %271 {offsets = [0, 32], sizes = [8, 32], strides = [1, 1]} : vector<8x128xf32> to vector<8x32xf32>
    %279 = arith.negf %278 : vector<8x32xf32>
    %280 = math.exp %279 : vector<8x32xf32>
    %cst_104 = arith.constant 1.000000e+00 : f32
    %281 = vector.broadcast %cst_104 : f32 to vector<8x32xf32>
    %282 = arith.addf %281, %280 : vector<8x32xf32>
    %283 = arith.divf %281, %282 : vector<8x32xf32>
    %284 = vector.extract_strided_slice %271 {offsets = [0, 64], sizes = [8, 32], strides = [1, 1]} : vector<8x128xf32> to vector<8x32xf32>
    %285 = math.tanh %284 : vector<8x32xf32>
    %286 = vector.extract_strided_slice %271 {offsets = [0, 96], sizes = [8, 32], strides = [1, 1]} : vector<8x128xf32> to vector<8x32xf32>
    %287 = arith.negf %286 : vector<8x32xf32>
    %288 = math.exp %287 : vector<8x32xf32>
    %cst_105 = arith.constant 1.000000e+00 : f32
    %289 = vector.broadcast %cst_105 : f32 to vector<8x32xf32>
    %290 = arith.addf %289, %288 : vector<8x32xf32>
    %291 = arith.divf %289, %290 : vector<8x32xf32>
    %292 = arith.mulf %283, %251 : vector<8x32xf32>
    %293 = arith.mulf %277, %285 : vector<8x32xf32>
    %294 = arith.addf %292, %293 : vector<8x32xf32>
    %295 = math.tanh %294 : vector<8x32xf32>
    %296 = arith.mulf %291, %295 : vector<8x32xf32>
    %297 = arith.addf %296, %9 : vector<8x32xf32>
    %298 = arith.truncf %297 : vector<8x32xf32> to vector<8x32xbf16>
    %cst_106 = arith.constant dense<0.000000e+00> : vector<8x5xf32>
    %299 = tpu.matmul %298, %242, %cst_106 {dimension_numbers = #tpu.dot_dimension_numbers<[1], [1], [0], [0], [0, 0, 1, 0], [], []>} : vector<8x32xbf16>, vector<5x32xbf16>, vector<8x5xf32> -> vector<8x5xf32>
    %cst_107 = arith.constant dense<0xFF800000> : vector<8xf32>
    %300 = vector.multi_reduction <maximumf>, %299, %cst_107 [1] : vector<8x5xf32> to vector<8xf32>
    %301 = vector.shape_cast %300 : vector<8xf32> to vector<8x1xf32>
    %302 = vector.broadcast %301 : vector<8x1xf32> to vector<8x5xf32>
    %303 = arith.subf %299, %302 : vector<8x5xf32>
    %304 = math.exp %303 : vector<8x5xf32>
    %cst_108 = arith.constant dense<0.000000e+00> : vector<8xf32>
    %305 = vector.multi_reduction <add>, %304, %cst_108 [1] : vector<8x5xf32> to vector<8xf32>
    %306 = vector.shape_cast %305 : vector<8xf32> to vector<8x1xf32>
    %307 = tpu.reciprocal %306 {approx = true} : vector<8x1xf32> -> vector<8x1xf32>
    %308 = vector.broadcast %307 : vector<8x1xf32> to vector<8x5xf32>
    %309 = arith.mulf %304, %308 : vector<8x5xf32>
    %310 = arith.truncf %309 : vector<8x5xf32> to vector<8x5xbf16>
    %cst_109 = arith.constant dense<0.000000e+00> : vector<8x32xf32>
    %311 = tpu.matmul %310, %242, %cst_109 {dimension_numbers = #tpu.dot_dimension_numbers<[1], [0], [0], [1], [0, 0, 1, 1], [], []>} : vector<8x5xbf16>, vector<5x32xbf16>, vector<8x32xf32> -> vector<8x32xf32>
    %312 = arith.truncf %311 : vector<8x32xf32> to vector<8x32xbf16>
    %cst_110 = arith.constant dense<0.000000e+00> : vector<8x128xf32>
    %313 = tpu.matmul %312, %249, %cst_110 {dimension_numbers = #tpu.dot_dimension_numbers<[1], [0], [0], [1], [0, 0, 1, 1], [], []>} : vector<8x32xbf16>, vector<32x128xbf16>, vector<8x128xf32> -> vector<8x128xf32>
    %314 = arith.addf %248, %313 : vector<8x128xf32>
    %315 = arith.truncf %297 : vector<8x32xf32> to vector<8x32xbf16>
    %cst_111 = arith.constant dense<0.000000e+00> : vector<8x128xf32>
    %316 = tpu.matmul %315, %250, %cst_111 {dimension_numbers = #tpu.dot_dimension_numbers<[1], [0], [0], [1], [0, 0, 1, 1], [], []>} : vector<8x32xbf16>, vector<32x128xbf16>, vector<8x128xf32> -> vector<8x128xf32>
    %317 = arith.addf %314, %316 : vector<8x128xf32>
    %318 = vector.extract_strided_slice %317 {offsets = [0, 0], sizes = [8, 32], strides = [1, 1]} : vector<8x128xf32> to vector<8x32xf32>
    %319 = arith.negf %318 : vector<8x32xf32>
    %320 = math.exp %319 : vector<8x32xf32>
    %cst_112 = arith.constant 1.000000e+00 : f32
    %321 = vector.broadcast %cst_112 : f32 to vector<8x32xf32>
    %322 = arith.addf %321, %320 : vector<8x32xf32>
    %323 = arith.divf %321, %322 : vector<8x32xf32>
    %324 = vector.extract_strided_slice %317 {offsets = [0, 32], sizes = [8, 32], strides = [1, 1]} : vector<8x128xf32> to vector<8x32xf32>
    %325 = arith.negf %324 : vector<8x32xf32>
    %326 = math.exp %325 : vector<8x32xf32>
    %cst_113 = arith.constant 1.000000e+00 : f32
    %327 = vector.broadcast %cst_113 : f32 to vector<8x32xf32>
    %328 = arith.addf %327, %326 : vector<8x32xf32>
    %329 = arith.divf %327, %328 : vector<8x32xf32>
    %330 = vector.extract_strided_slice %317 {offsets = [0, 64], sizes = [8, 32], strides = [1, 1]} : vector<8x128xf32> to vector<8x32xf32>
    %331 = math.tanh %330 : vector<8x32xf32>
    %332 = vector.extract_strided_slice %317 {offsets = [0, 96], sizes = [8, 32], strides = [1, 1]} : vector<8x128xf32> to vector<8x32xf32>
    %333 = arith.negf %332 : vector<8x32xf32>
    %334 = math.exp %333 : vector<8x32xf32>
    %cst_114 = arith.constant 1.000000e+00 : f32
    %335 = vector.broadcast %cst_114 : f32 to vector<8x32xf32>
    %336 = arith.addf %335, %334 : vector<8x32xf32>
    %337 = arith.divf %335, %336 : vector<8x32xf32>
    %338 = arith.mulf %329, %294 : vector<8x32xf32>
    %339 = arith.mulf %323, %331 : vector<8x32xf32>
    %340 = arith.addf %338, %339 : vector<8x32xf32>
    %341 = math.tanh %340 : vector<8x32xf32>
    %342 = arith.mulf %337, %341 : vector<8x32xf32>
    %343 = arith.addf %342, %9 : vector<8x32xf32>
    %344 = arith.truncf %343 : vector<8x32xf32> to vector<8x32xbf16>
    %cst_115 = arith.constant dense<0.000000e+00> : vector<8x5xf32>
    %345 = tpu.matmul %344, %242, %cst_115 {dimension_numbers = #tpu.dot_dimension_numbers<[1], [1], [0], [0], [0, 0, 1, 0], [], []>} : vector<8x32xbf16>, vector<5x32xbf16>, vector<8x5xf32> -> vector<8x5xf32>
    %cst_116 = arith.constant dense<0xFF800000> : vector<8xf32>
    %346 = vector.multi_reduction <maximumf>, %345, %cst_116 [1] : vector<8x5xf32> to vector<8xf32>
    %347 = vector.shape_cast %346 : vector<8xf32> to vector<8x1xf32>
    %348 = vector.broadcast %347 : vector<8x1xf32> to vector<8x5xf32>
    %349 = arith.subf %345, %348 : vector<8x5xf32>
    %350 = math.exp %349 : vector<8x5xf32>
    %cst_117 = arith.constant dense<0.000000e+00> : vector<8xf32>
    %351 = vector.multi_reduction <add>, %350, %cst_117 [1] : vector<8x5xf32> to vector<8xf32>
    %352 = vector.shape_cast %351 : vector<8xf32> to vector<8x1xf32>
    %353 = tpu.reciprocal %352 {approx = true} : vector<8x1xf32> -> vector<8x1xf32>
    %354 = vector.broadcast %353 : vector<8x1xf32> to vector<8x5xf32>
    %355 = arith.mulf %350, %354 : vector<8x5xf32>
    %356 = arith.truncf %355 : vector<8x5xf32> to vector<8x5xbf16>
    %cst_118 = arith.constant dense<0.000000e+00> : vector<8x32xf32>
    %357 = tpu.matmul %356, %242, %cst_118 {dimension_numbers = #tpu.dot_dimension_numbers<[1], [0], [0], [1], [0, 0, 1, 1], [], []>} : vector<8x5xbf16>, vector<5x32xbf16>, vector<8x32xf32> -> vector<8x32xf32>
    %358 = arith.truncf %357 : vector<8x32xf32> to vector<8x32xbf16>
    %cst_119 = arith.constant dense<0.000000e+00> : vector<8x128xf32>
    %359 = tpu.matmul %358, %249, %cst_119 {dimension_numbers = #tpu.dot_dimension_numbers<[1], [0], [0], [1], [0, 0, 1, 1], [], []>} : vector<8x32xbf16>, vector<32x128xbf16>, vector<8x128xf32> -> vector<8x128xf32>
    %360 = arith.addf %248, %359 : vector<8x128xf32>
    %361 = arith.truncf %343 : vector<8x32xf32> to vector<8x32xbf16>
    %cst_120 = arith.constant dense<0.000000e+00> : vector<8x128xf32>
    %362 = tpu.matmul %361, %250, %cst_120 {dimension_numbers = #tpu.dot_dimension_numbers<[1], [0], [0], [1], [0, 0, 1, 1], [], []>} : vector<8x32xbf16>, vector<32x128xbf16>, vector<8x128xf32> -> vector<8x128xf32>
    %363 = arith.addf %360, %362 : vector<8x128xf32>
    %364 = vector.extract_strided_slice %363 {offsets = [0, 0], sizes = [8, 32], strides = [1, 1]} : vector<8x128xf32> to vector<8x32xf32>
    %365 = arith.negf %364 : vector<8x32xf32>
    %366 = math.exp %365 : vector<8x32xf32>
    %cst_121 = arith.constant 1.000000e+00 : f32
    %367 = vector.broadcast %cst_121 : f32 to vector<8x32xf32>
    %368 = arith.addf %367, %366 : vector<8x32xf32>
    %369 = arith.divf %367, %368 : vector<8x32xf32>
    %370 = vector.extract_strided_slice %363 {offsets = [0, 32], sizes = [8, 32], strides = [1, 1]} : vector<8x128xf32> to vector<8x32xf32>
    %371 = arith.negf %370 : vector<8x32xf32>
    %372 = math.exp %371 : vector<8x32xf32>
    %cst_122 = arith.constant 1.000000e+00 : f32
    %373 = vector.broadcast %cst_122 : f32 to vector<8x32xf32>
    %374 = arith.addf %373, %372 : vector<8x32xf32>
    %375 = arith.divf %373, %374 : vector<8x32xf32>
    %376 = vector.extract_strided_slice %363 {offsets = [0, 64], sizes = [8, 32], strides = [1, 1]} : vector<8x128xf32> to vector<8x32xf32>
    %377 = math.tanh %376 : vector<8x32xf32>
    %378 = vector.extract_strided_slice %363 {offsets = [0, 96], sizes = [8, 32], strides = [1, 1]} : vector<8x128xf32> to vector<8x32xf32>
    %379 = arith.negf %378 : vector<8x32xf32>
    %380 = math.exp %379 : vector<8x32xf32>
    %cst_123 = arith.constant 1.000000e+00 : f32
    %381 = vector.broadcast %cst_123 : f32 to vector<8x32xf32>
    %382 = arith.addf %381, %380 : vector<8x32xf32>
    %383 = arith.divf %381, %382 : vector<8x32xf32>
    %384 = arith.mulf %375, %340 : vector<8x32xf32>
    %385 = arith.mulf %369, %377 : vector<8x32xf32>
    %386 = arith.addf %384, %385 : vector<8x32xf32>
    %387 = math.tanh %386 : vector<8x32xf32>
    %388 = arith.mulf %383, %387 : vector<8x32xf32>
    %389 = arith.addf %388, %9 : vector<8x32xf32>
    %390 = arith.truncf %389 : vector<8x32xf32> to vector<8x32xbf16>
    %cst_124 = arith.constant dense<0.000000e+00> : vector<8x5xf32>
    %391 = tpu.matmul %390, %242, %cst_124 {dimension_numbers = #tpu.dot_dimension_numbers<[1], [1], [0], [0], [0, 0, 1, 0], [], []>} : vector<8x32xbf16>, vector<5x32xbf16>, vector<8x5xf32> -> vector<8x5xf32>
    %cst_125 = arith.constant dense<0xFF800000> : vector<8xf32>
    %392 = vector.multi_reduction <maximumf>, %391, %cst_125 [1] : vector<8x5xf32> to vector<8xf32>
    %393 = vector.shape_cast %392 : vector<8xf32> to vector<8x1xf32>
    %394 = vector.broadcast %393 : vector<8x1xf32> to vector<8x5xf32>
    %395 = arith.subf %391, %394 : vector<8x5xf32>
    %396 = math.exp %395 : vector<8x5xf32>
    %cst_126 = arith.constant dense<0.000000e+00> : vector<8xf32>
    %397 = vector.multi_reduction <add>, %396, %cst_126 [1] : vector<8x5xf32> to vector<8xf32>
    %398 = vector.shape_cast %397 : vector<8xf32> to vector<8x1xf32>
    %399 = tpu.reciprocal %398 {approx = true} : vector<8x1xf32> -> vector<8x1xf32>
    %400 = vector.broadcast %399 : vector<8x1xf32> to vector<8x5xf32>
    %401 = arith.mulf %396, %400 : vector<8x5xf32>
    %402 = arith.truncf %401 : vector<8x5xf32> to vector<8x5xbf16>
    %cst_127 = arith.constant dense<0.000000e+00> : vector<8x32xf32>
    %403 = tpu.matmul %402, %242, %cst_127 {dimension_numbers = #tpu.dot_dimension_numbers<[1], [0], [0], [1], [0, 0, 1, 1], [], []>} : vector<8x5xbf16>, vector<5x32xbf16>, vector<8x32xf32> -> vector<8x32xf32>
    %404 = arith.truncf %403 : vector<8x32xf32> to vector<8x32xbf16>
    %cst_128 = arith.constant dense<0.000000e+00> : vector<8x128xf32>
    %405 = tpu.matmul %404, %249, %cst_128 {dimension_numbers = #tpu.dot_dimension_numbers<[1], [0], [0], [1], [0, 0, 1, 1], [], []>} : vector<8x32xbf16>, vector<32x128xbf16>, vector<8x128xf32> -> vector<8x128xf32>
    %406 = arith.addf %248, %405 : vector<8x128xf32>
    %407 = arith.truncf %389 : vector<8x32xf32> to vector<8x32xbf16>
    %cst_129 = arith.constant dense<0.000000e+00> : vector<8x128xf32>
    %408 = tpu.matmul %407, %250, %cst_129 {dimension_numbers = #tpu.dot_dimension_numbers<[1], [0], [0], [1], [0, 0, 1, 1], [], []>} : vector<8x32xbf16>, vector<32x128xbf16>, vector<8x128xf32> -> vector<8x128xf32>
    %409 = arith.addf %406, %408 : vector<8x128xf32>
    %410 = vector.extract_strided_slice %409 {offsets = [0, 0], sizes = [8, 32], strides = [1, 1]} : vector<8x128xf32> to vector<8x32xf32>
    %411 = arith.negf %410 : vector<8x32xf32>
    %412 = math.exp %411 : vector<8x32xf32>
    %cst_130 = arith.constant 1.000000e+00 : f32
    %413 = vector.broadcast %cst_130 : f32 to vector<8x32xf32>
    %414 = arith.addf %413, %412 : vector<8x32xf32>
    %415 = arith.divf %413, %414 : vector<8x32xf32>
    %416 = vector.extract_strided_slice %409 {offsets = [0, 32], sizes = [8, 32], strides = [1, 1]} : vector<8x128xf32> to vector<8x32xf32>
    %417 = arith.negf %416 : vector<8x32xf32>
    %418 = math.exp %417 : vector<8x32xf32>
    %cst_131 = arith.constant 1.000000e+00 : f32
    %419 = vector.broadcast %cst_131 : f32 to vector<8x32xf32>
    %420 = arith.addf %419, %418 : vector<8x32xf32>
    %421 = arith.divf %419, %420 : vector<8x32xf32>
    %422 = vector.extract_strided_slice %409 {offsets = [0, 64], sizes = [8, 32], strides = [1, 1]} : vector<8x128xf32> to vector<8x32xf32>
    %423 = math.tanh %422 : vector<8x32xf32>
    %424 = vector.extract_strided_slice %409 {offsets = [0, 96], sizes = [8, 32], strides = [1, 1]} : vector<8x128xf32> to vector<8x32xf32>
    %425 = arith.negf %424 : vector<8x32xf32>
    %426 = math.exp %425 : vector<8x32xf32>
    %cst_132 = arith.constant 1.000000e+00 : f32
    %427 = vector.broadcast %cst_132 : f32 to vector<8x32xf32>
    %428 = arith.addf %427, %426 : vector<8x32xf32>
    %429 = arith.divf %427, %428 : vector<8x32xf32>
    %430 = arith.mulf %421, %386 : vector<8x32xf32>
    %431 = arith.mulf %415, %423 : vector<8x32xf32>
    %432 = arith.addf %430, %431 : vector<8x32xf32>
    %433 = math.tanh %432 : vector<8x32xf32>
    %434 = arith.mulf %429, %433 : vector<8x32xf32>
    %435 = arith.addf %434, %9 : vector<8x32xf32>
    %436 = arith.truncf %435 : vector<8x32xf32> to vector<8x32xbf16>
    %cst_133 = arith.constant dense<0.000000e+00> : vector<8x5xf32>
    %437 = tpu.matmul %436, %242, %cst_133 {dimension_numbers = #tpu.dot_dimension_numbers<[1], [1], [0], [0], [0, 0, 1, 0], [], []>} : vector<8x32xbf16>, vector<5x32xbf16>, vector<8x5xf32> -> vector<8x5xf32>
    %cst_134 = arith.constant dense<0xFF800000> : vector<8xf32>
    %438 = vector.multi_reduction <maximumf>, %437, %cst_134 [1] : vector<8x5xf32> to vector<8xf32>
    %439 = vector.shape_cast %438 : vector<8xf32> to vector<8x1xf32>
    %440 = vector.broadcast %439 : vector<8x1xf32> to vector<8x5xf32>
    %441 = arith.subf %437, %440 : vector<8x5xf32>
    %442 = math.exp %441 : vector<8x5xf32>
    %cst_135 = arith.constant dense<0.000000e+00> : vector<8xf32>
    %443 = vector.multi_reduction <add>, %442, %cst_135 [1] : vector<8x5xf32> to vector<8xf32>
    %444 = vector.shape_cast %443 : vector<8xf32> to vector<8x1xf32>
    %445 = tpu.reciprocal %444 {approx = true} : vector<8x1xf32> -> vector<8x1xf32>
    %446 = vector.broadcast %445 : vector<8x1xf32> to vector<8x5xf32>
    %447 = arith.mulf %442, %446 : vector<8x5xf32>
    %448 = arith.truncf %447 : vector<8x5xf32> to vector<8x5xbf16>
    %cst_136 = arith.constant dense<0.000000e+00> : vector<8x32xf32>
    %449 = tpu.matmul %448, %242, %cst_136 {dimension_numbers = #tpu.dot_dimension_numbers<[1], [0], [0], [1], [0, 0, 1, 1], [], []>} : vector<8x5xbf16>, vector<5x32xbf16>, vector<8x32xf32> -> vector<8x32xf32>
    %450 = arith.truncf %449 : vector<8x32xf32> to vector<8x32xbf16>
    %cst_137 = arith.constant dense<0.000000e+00> : vector<8x128xf32>
    %451 = tpu.matmul %450, %249, %cst_137 {dimension_numbers = #tpu.dot_dimension_numbers<[1], [0], [0], [1], [0, 0, 1, 1], [], []>} : vector<8x32xbf16>, vector<32x128xbf16>, vector<8x128xf32> -> vector<8x128xf32>
    %452 = arith.addf %248, %451 : vector<8x128xf32>
    %453 = arith.truncf %435 : vector<8x32xf32> to vector<8x32xbf16>
    %cst_138 = arith.constant dense<0.000000e+00> : vector<8x128xf32>
    %454 = tpu.matmul %453, %250, %cst_138 {dimension_numbers = #tpu.dot_dimension_numbers<[1], [0], [0], [1], [0, 0, 1, 1], [], []>} : vector<8x32xbf16>, vector<32x128xbf16>, vector<8x128xf32> -> vector<8x128xf32>
    %455 = arith.addf %452, %454 : vector<8x128xf32>
    %456 = vector.extract_strided_slice %455 {offsets = [0, 0], sizes = [8, 32], strides = [1, 1]} : vector<8x128xf32> to vector<8x32xf32>
    %457 = arith.negf %456 : vector<8x32xf32>
    %458 = math.exp %457 : vector<8x32xf32>
    %cst_139 = arith.constant 1.000000e+00 : f32
    %459 = vector.broadcast %cst_139 : f32 to vector<8x32xf32>
    %460 = arith.addf %459, %458 : vector<8x32xf32>
    %461 = arith.divf %459, %460 : vector<8x32xf32>
    %462 = vector.extract_strided_slice %455 {offsets = [0, 32], sizes = [8, 32], strides = [1, 1]} : vector<8x128xf32> to vector<8x32xf32>
    %463 = arith.negf %462 : vector<8x32xf32>
    %464 = math.exp %463 : vector<8x32xf32>
    %cst_140 = arith.constant 1.000000e+00 : f32
    %465 = vector.broadcast %cst_140 : f32 to vector<8x32xf32>
    %466 = arith.addf %465, %464 : vector<8x32xf32>
    %467 = arith.divf %465, %466 : vector<8x32xf32>
    %468 = vector.extract_strided_slice %455 {offsets = [0, 64], sizes = [8, 32], strides = [1, 1]} : vector<8x128xf32> to vector<8x32xf32>
    %469 = math.tanh %468 : vector<8x32xf32>
    %470 = vector.extract_strided_slice %455 {offsets = [0, 96], sizes = [8, 32], strides = [1, 1]} : vector<8x128xf32> to vector<8x32xf32>
    %471 = arith.negf %470 : vector<8x32xf32>
    %472 = math.exp %471 : vector<8x32xf32>
    %cst_141 = arith.constant 1.000000e+00 : f32
    %473 = vector.broadcast %cst_141 : f32 to vector<8x32xf32>
    %474 = arith.addf %473, %472 : vector<8x32xf32>
    %475 = arith.divf %473, %474 : vector<8x32xf32>
    %476 = arith.mulf %467, %432 : vector<8x32xf32>
    %477 = arith.mulf %461, %469 : vector<8x32xf32>
    %478 = arith.addf %476, %477 : vector<8x32xf32>
    %479 = math.tanh %478 : vector<8x32xf32>
    %480 = arith.mulf %475, %479 : vector<8x32xf32>
    %481 = arith.addf %480, %9 : vector<8x32xf32>
    %482 = arith.mulf %481, %481 : vector<8x32xf32>
    %cst_142 = arith.constant dense<0.000000e+00> : vector<8xf32>
    %483 = vector.multi_reduction <add>, %482, %cst_142 [1] : vector<8x32xf32> to vector<8xf32>
    %484 = vector.shape_cast %483 : vector<8xf32> to vector<8x1xf32>
    %485 = math.sqrt %484 : vector<8x1xf32>
    %cst_143 = arith.constant 9.99999996E-13 : f32
    %486 = vector.broadcast %cst_143 : f32 to vector<8x1xf32>
    %487 = arith.maximumf %485, %486 : vector<8x1xf32>
    %488 = tpu.reciprocal %487 {approx = true} : vector<8x1xf32> -> vector<8x1xf32>
    %489 = arith.mulf %241, %241 : vector<5x32xf32>
    %cst_144 = arith.constant dense<0.000000e+00> : vector<5xf32>
    %490 = vector.multi_reduction <add>, %489, %cst_144 [1] : vector<5x32xf32> to vector<5xf32>
    %491 = vector.shape_cast %490 : vector<5xf32> to vector<5x1xf32>
    %492 = math.sqrt %491 : vector<5x1xf32>
    %cst_145 = arith.constant 9.99999996E-13 : f32
    %493 = vector.broadcast %cst_145 : f32 to vector<5x1xf32>
    %494 = arith.maximumf %492, %493 : vector<5x1xf32>
    %495 = tpu.reciprocal %494 {approx = true} : vector<5x1xf32> -> vector<5x1xf32>
    %496 = vector.broadcast %488 : vector<8x1xf32> to vector<8x32xf32>
    %497 = arith.mulf %481, %496 : vector<8x32xf32>
    %498 = vector.broadcast %495 : vector<5x1xf32> to vector<5x32xf32>
    %499 = arith.mulf %241, %498 : vector<5x32xf32>
    %cst_146 = arith.constant dense<0.000000e+00> : vector<8x5xf32>
    %500 = tpu.matmul %497, %499, %cst_146 {dimension_numbers = #tpu.dot_dimension_numbers<[1], [1], [0], [0], [0, 0, 1, 0], [], []>} : vector<8x32xf32>, vector<5x32xf32>, vector<8x5xf32> -> vector<8x5xf32>
    %c0_147 = arith.constant 0 : index
    %c0_148 = arith.constant 0 : index
    %501 = vector.load %arg13[%c0_147, %c0_148] : memref<5x5xf32, #tpu.memory_space<vmem>>, vector<5x5xf32>
    %cst_149 = arith.constant dense<0.000000e+00> : vector<8x5xf32>
    %502 = tpu.matmul %500, %501, %cst_149 {dimension_numbers = #tpu.dot_dimension_numbers<[1], [0], [0], [1], [0, 0, 1, 1], [], []>} : vector<8x5xf32>, vector<5x5xf32>, vector<8x5xf32> -> vector<8x5xf32>
    %c0_150 = arith.constant 0 : index
    %c0_151 = arith.constant 0 : index
    %503 = vector.load %arg14[%c0_150, %c0_151] : memref<8x5xf32, #tpu.memory_space<vmem>>, vector<8x5xf32>
    tpu.vector_store %arg14[%c0_150, %c0_151], %502 {strides = array<i32>} : memref<8x5xf32, #tpu.memory_space<vmem>>, vector<8x5xf32>,
    return
  }
}

</mosaic_0001>

<bundles_post_ra>
// kernel: matching_net_forward.1
= control target key start
LH: loop header
LB: loop body
LE: loop exit
PB: predicated region body
PF: predicated region fallthrough
CT: control target
= control target key end

     0   :  { %s4642_s0 = inlined_call_operand.vmem [shape: bf16[13,1024], index: 0, kind: input, shape index: {}]   ;;  %s4643_s1 = inlined_call_operand.vmem [shape: bf16[1024,32], index: 1, kind: input, shape index: {}]   ;;  %s4644_s2 = inlined_call_operand.vmem [shape: f32[1,32], index: 2, kind: input, shape index: {}]   ;;  %s4645_s3 = inlined_call_operand.vmem [shape: bf16[32,128], index: 3, kind: input, shape index: {}]   ;;  %s4646_s4 = inlined_call_operand.vmem [shape: bf16[32,128], index: 4, kind: input, shape index: {}]   ;;  %s4647_s5 = inlined_call_operand.vmem [shape: f32[1,128], index: 5, kind: input, shape index: {}]   ;;  %s4648_s6 = inlined_call_operand.vmem [shape: bf16[32,128], index: 6, kind: input, shape index: {}]   ;;  %s4649_s7 = inlined_call_operand.vmem [shape: bf16[32,128], index: 7, kind: input, shape index: {}]   ;;  %s4650_s8 = inlined_call_operand.vmem [shape: f32[1,128], index: 8, kind: input, shape index: {}]   ;;  %s4651_s9 = inlined_call_operand.vmem [shape: bf16[32,128], index: 9, kind: input, shape index: {}]   ;;  %s4652_s10 = inlined_call_operand.vmem [shape: bf16[32,128], index: 10, kind: input, shape index: {}]   ;;  %s4653_s11 = inlined_call_operand.vmem [shape: bf16[32,128], index: 11, kind: input, shape index: {}]   ;;  %s4654_s12 = inlined_call_operand.vmem [shape: f32[1,128], index: 12, kind: input, shape index: {}]   ;;  %s4655_s13 = inlined_call_operand.vmem [shape: f32[5,5], index: 13, kind: input, shape index: {}]   ;;  %s4656_s14 = inlined_call_operand.hbm [shape: f32[8,5], index: 14, kind: output, shape index: {}]  }
   0x1   :  { %v3656_v0 = vld [vmem:[%s4643_s1 + $0x40] sm:$0xff]   ;;  %v3660_v4 = vld [vmem:[%s4643_s1 + $0x48] sm:$0xff]   ;;  %v3664_v8 = vld [vmem:[%s4643_s1 + $0x50] sm:$0xff]  }
   0x2   :  { %v3657_v1 = vld [vmem:[%s4643_s1 + $0xc0] sm:$0xff]   ;;  %3188 = vmatprep.subr.bf16.mxu0 %v3656_v0  ;;  %v3661_v5 = vld [vmem:[%s4643_s1 + $0xc8] sm:$0xff]   ;;  %v3665_v9 = vld [vmem:[%s4643_s1 + $0xd0] sm:$0xff]  }
   0x3   :  { %v3658_v2 = vld [vmem:[%s4643_s1] sm:$0xff]   ;;  %3210 = vmatprep.subr.bf16.mxu1 %v3657_v1  ;;  %v3662_v6 = vld [vmem:[%s4643_s1 + $0x8] sm:$0xff]   ;;  %v3666_v10 = vld [vmem:[%s4643_s1 + $0x10] sm:$0xff]  }
   0x4   :  { %v3659_v3 = vld [vmem:[%s4643_s1 + $0x80] sm:$0xff]   ;;  %3189 = vmatpush3.bf16.msra.mxu0 %v3658_v2  ;;  %v3663_v7 = vld [vmem:[%s4643_s1 + $0x88] sm:$0xff]   ;;  %v3667_v11 = vld [vmem:[%s4643_s1 + $0x90] sm:$0xff]  }
   0x5   :  { %3211 = vmatpush3.bf16.msra.mxu1 %v3659_v3  ;;  %3190 = vmatprep.subr.bf16.mxu0 %v3660_v4  ;;  %v3668_v12 = vld [vmem:[%s4643_s1 + $0x58] sm:$0xff]   ;;  %v3672_v16 = vld [vmem:[%s4643_s1 + $0x60] sm:$0xff]   ;;  %v3676_v20 = vld [vmem:[%s4643_s1 + $0x68] sm:$0xff]  }
   0x6   :  { %3212 = vmatprep.subr.bf16.mxu1 %v3661_v5  ;;  %v3669_v13 = vld [vmem:[%s4643_s1 + $0xd8] sm:$0xff]   ;;  %v3673_v17 = vld [vmem:[%s4643_s1 + $0xe0] sm:$0xff]   ;;  %v3677_v21 = vld [vmem:[%s4643_s1 + $0xe8] sm:$0xff]  }
   0x7   :  { %v3670_v14 = vld [vmem:[%s4643_s1 + $0x18] sm:$0xff]   ;;  %v3674_v18 = vld [vmem:[%s4643_s1 + $0x20] sm:$0xff]   ;;  %v3678_v22 = vld [vmem:[%s4643_s1 + $0x28] sm:$0xff]  }
   0x8   :  { %3191 = vmatpush3.bf16.msra.mxu0 %v3662_v6  ;;  %v3671_v15 = vld [vmem:[%s4643_s1 + $0x98] sm:$0xff]   ;;  %v3675_v19 = vld [vmem:[%s4643_s1 + $0xa0] sm:$0xff]   ;;  %v3679_v23 = vld [vmem:[%s4643_s1 + $0xa8] sm:$0xff]  }
   0x9   :  { %3213 = vmatpush3.bf16.msra.mxu1 %v3663_v7  ;;  %3192 = vmatprep.subr.bf16.mxu0 %v3664_v8  ;;  %v3680_v24 = vld [vmem:[%s4643_s1 + $0x70] sm:$0xff]   ;;  %v3684_v28 = vld [vmem:[%s4643_s1 + $0x78] sm:$0xff]   ;;  %v49_v32 = vld [vmem:[%s4642_s0] sm:$0xff] }
   0xa   :  { %3214 = vmatprep.subr.bf16.mxu1 %v3665_v9  ;;  %v3681_v25 = vld [vmem:[%s4643_s1 + $0xf0] sm:$0xff]   ;;  %v3685_v29 = vld [vmem:[%s4643_s1 + $0xf8] sm:$0xff]   ;;  %v53_v33 = vld [vmem:[%s4642_s0 + $0x20] sm:$0x77] }
   0xb   :  { %v3682_v26 = vld [vmem:[%s4643_s1 + $0x30] sm:$0xff]   ;;  %v3686_v30 = vld [vmem:[%s4643_s1 + $0x38] sm:$0xff]   ;;  %v50_v34 = vld [vmem:[%s4642_s0 + $0x8] sm:$0xff]  ;;  %v3054_v35 = vcombine.low %v49_v32, %v53_v33  ;;  %v3055_v36 = vcombine.high %v49_v32, %v53_v33 }
   0xc   :  { %3193 = vmatpush3.bf16.msra.mxu0 %v3666_v10  ;;  %v3683_v27 = vld [vmem:[%s4643_s1 + $0xb0] sm:$0xff]   ;;  %v3687_v31 = vld [vmem:[%s4643_s1 + $0xb8] sm:$0xff]   ;;  %v54_v37 = vld [vmem:[%s4642_s0 + $0x28] sm:$0x77] }
   0xd   :  { %3215 = vmatpush3.bf16.msra.mxu1 %v3667_v11  ;;  %3194 = vmatprep.subr.bf16.mxu0 %v3668_v12  ;;  %v3056_v38 = vcombine.low %v50_v34, %v54_v37  ;;  %v3057_v39 = vcombine.high %v50_v34, %v54_v37  ;;  %v3688_v40 = vld [vmem:[%s4643_s1 + $0x140] sm:$0xff]   ;;  %v3692_v44 = vld [vmem:[%s4643_s1 + $0x148] sm:$0xff]   ;;  %v3696_v48 = vld [vmem:[%s4643_s1 + $0x150] sm:$0xff]  }
   0xe   :  { %3216 = vmatprep.subr.bf16.mxu1 %v3669_v13  ;;  %648 = vmatprep.mubr.bf16.mxu0 %v3055_v36  ;;  %v3689_v41 = vld [vmem:[%s4643_s1 + $0x1c0] sm:$0xff]   ;;  %v3693_v45 = vld [vmem:[%s4643_s1 + $0x1c8] sm:$0xff]   ;;  %v3697_v49 = vld [vmem:[%s4643_s1 + $0x1d0] sm:$0xff]  }
   0xf   :  { %689 = vmatprep.mubr.bf16.mxu1 %v3057_v39  ;;  %v3690_v42 = vld [vmem:[%s4643_s1 + $0x100] sm:$0xff]   ;;  %v3694_v46 = vld [vmem:[%s4643_s1 + $0x108] sm:$0xff]   ;;  %v3698_v50 = vld [vmem:[%s4643_s1 + $0x110] sm:$0xff]  }
  0x10   :  { %3195 = vmatpush3.bf16.msra.mxu0 %v3670_v14  ;;  %v3691_v43 = vld [vmem:[%s4643_s1 + $0x180] sm:$0xff]   ;;  %v3695_v47 = vld [vmem:[%s4643_s1 + $0x188] sm:$0xff]   ;;  %v3699_v51 = vld [vmem:[%s4643_s1 + $0x190] sm:$0xff]  }
  0x11   :  { %3217 = vmatpush3.bf16.msra.mxu1 %v3671_v15  ;;  %3196 = vmatprep.subr.bf16.mxu0 %v3672_v16  ;;  %v3700_v52 = vld [vmem:[%s4643_s1 + $0x158] sm:$0xff]   ;;  %v3704_v56 = vld [vmem:[%s4643_s1 + $0x160] sm:$0xff]   ;;  %v3708_v60 = vld [vmem:[%s4643_s1 + $0x168] sm:$0xff]  }
  0x12   :  { %3218 = vmatprep.subr.bf16.mxu1 %v3673_v17  ;;  %v3701_v53 = vld [vmem:[%s4643_s1 + $0x1d8] sm:$0xff]   ;;  %v3705_v57 = vld [vmem:[%s4643_s1 + $0x1e0] sm:$0xff]   ;;  %v3709_v61 = vld [vmem:[%s4643_s1 + $0x1e8] sm:$0xff]  }
  0x13   :  { %v3702_v54 = vld [vmem:[%s4643_s1 + $0x118] sm:$0xff]   ;;  %v3706_v58 = vld [vmem:[%s4643_s1 + $0x120] sm:$0xff]   ;;  %v3710_v62 = vld [vmem:[%s4643_s1 + $0x128] sm:$0xff]  }
  0x14   :  { %3197 = vmatpush3.bf16.msra.mxu0 %v3674_v18  ;;  %v3703_v55 = vld [vmem:[%s4643_s1 + $0x198] sm:$0xff]   ;;  %v3707_v59 = vld [vmem:[%s4643_s1 + $0x1a0] sm:$0xff]   ;;  %v3711_v63 = vld [vmem:[%s4643_s1 + $0x1a8] sm:$0xff]  }
  0x15   :  { %3219 = vmatpush3.bf16.msra.mxu1 %v3675_v19  ;;  %3198 = vmatprep.subr.bf16.mxu0 %v3676_v20  ;;  %v3712_v0 = vld [vmem:[%s4643_s1 + $0x170] sm:$0xff]   ;;  %v3716_v4 = vld [vmem:[%s4643_s1 + $0x178] sm:$0xff]  }
  0x16   :  { %3220 = vmatprep.subr.bf16.mxu1 %v3677_v21  ;;  %v3713_v1 = vld [vmem:[%s4643_s1 + $0x1f0] sm:$0xff]   ;;  %v3717_v5 = vld [vmem:[%s4643_s1 + $0x1f8] sm:$0xff]  }
  0x17   :  { %v3714_v2 = vld [vmem:[%s4643_s1 + $0x130] sm:$0xff]   ;;  %v3718_v6 = vld [vmem:[%s4643_s1 + $0x138] sm:$0xff]  }
  0x18   :  { %3199 = vmatpush3.bf16.msra.mxu0 %v3678_v22  ;;  %v3715_v3 = vld [vmem:[%s4643_s1 + $0x1b0] sm:$0xff]   ;;  %v3719_v7 = vld [vmem:[%s4643_s1 + $0x1b8] sm:$0xff]  }
  0x19   :  { %3221 = vmatpush3.bf16.msra.mxu1 %v3679_v23  ;;  %3200 = vmatprep.subr.bf16.mxu0 %v3680_v24  ;;  %v51_v8 = vld [vmem:[%s4642_s0 + $0x10] sm:$0xff]  ;;  %v52_v12 = vld [vmem:[%s4642_s0 + $0x18] sm:$0xff] }
  0x1a   :  { %3222 = vmatprep.subr.bf16.mxu1 %v3681_v25  ;;  %v55_v9 = vld [vmem:[%s4642_s0 + $0x30] sm:$0x77]  ;;  %v56_v13 = vld [vmem:[%s4642_s0 + $0x38] sm:$0x77] }
  0x1b   :  { %v3058_v10 = vcombine.low %v51_v8, %v55_v9  ;;  %v3059_v11 = vcombine.high %v51_v8, %v55_v9  ;;  %v3060_v14 = vcombine.low %v52_v12, %v56_v13  ;;  %v3061_v15 = vcombine.high %v52_v12, %v56_v13 }
  0x1c   :  { %3201 = vmatpush3.bf16.msra.mxu0 %v3682_v26 }
  0x1d   :  { %3223 = vmatpush3.bf16.msra.mxu1 %v3683_v27  ;;  %3202 = vmatprep.subr.bf16.mxu0 %v3684_v28 }
  0x1e   :  { %3224 = vmatprep.subr.bf16.mxu1 %v3685_v29 }
  0x20   :  { %3203 = vmatpush3.bf16.msra.mxu0 %v3686_v30 }
  0x21   :  { %3225 = vmatpush3.bf16.msra.mxu1 %v3687_v31  ;;  %3232 = vmatprep.subr.bf16.mxu0 %v3688_v40 }
  0x22   :  { %3254 = vmatprep.subr.bf16.mxu1 %v3689_v41 }
  0x23   :  { %649 = vmatmul.mubr.bf16.vlgmr.msra.gmra.mrb[0].mxu0 %v3054_v35 }
  0x24   :  { %690 = vmatmul.mubr.bf16.vlgmr.msra.gmra.mrb[0].mxu1 %v3056_v38  ;;  %3233 = vmatpush3.bf16.msra.mxu0 %v3690_v42 }
  0x25   :  { %3255 = vmatpush3.bf16.msra.mxu1 %v3691_v43  ;;  %3234 = vmatprep.subr.bf16.mxu0 %v3692_v44 }
  0x26   :  { %3256 = vmatprep.subr.bf16.mxu1 %v3693_v45  ;;  %730 = vmatprep.mubr.bf16.mxu0 %v3059_v11 }
  0x27   :  { %771 = vmatprep.mubr.bf16.mxu1 %v3061_v15 }
  0x28   :  { %3235 = vmatpush3.bf16.msra.mxu0 %v3694_v46 }
  0x29   :  { %3257 = vmatpush3.bf16.msra.mxu1 %v3695_v47  ;;  %3236 = vmatprep.subr.bf16.mxu0 %v3696_v48 }
  0x2a   :  { %3258 = vmatprep.subr.bf16.mxu1 %v3697_v49 }
  0x2c   :  { %3237 = vmatpush3.bf16.msra.mxu0 %v3698_v50 }
  0x2d   :  { %3259 = vmatpush3.bf16.msra.mxu1 %v3699_v51  ;;  %3238 = vmatprep.subr.bf16.mxu0 %v3700_v52 }
  0x2e   :  { %3260 = vmatprep.subr.bf16.mxu1 %v3701_v53 }
  0x30   :  { %3239 = vmatpush3.bf16.msra.mxu0 %v3702_v54 }
  0x31   :  { %3261 = vmatpush3.bf16.msra.mxu1 %v3703_v55  ;;  %3240 = vmatprep.subr.bf16.mxu0 %v3704_v56 }
  0x32   :  { %3262 = vmatprep.subr.bf16.mxu1 %v3705_v57 }
  0x34   :  { %3241 = vmatpush3.bf16.msra.mxu0 %v3706_v58 }
  0x35   :  { %3263 = vmatpush3.bf16.msra.mxu1 %v3707_v59  ;;  %3242 = vmatprep.subr.bf16.mxu0 %v3708_v60 }
  0x36   :  { %3264 = vmatprep.subr.bf16.mxu1 %v3709_v61 }
  0x38   :  { %3243 = vmatpush3.bf16.msra.mxu0 %v3710_v62 }
  0x39   :  { %3265 = vmatpush3.bf16.msra.mxu1 %v3711_v63  ;;  %3244 = vmatprep.subr.bf16.mxu0 %v3712_v0 }
  0x3a   :  { %3266 = vmatprep.subr.bf16.mxu1 %v3713_v1 }
  0x3c   :  { %3245 = vmatpush3.bf16.msra.mxu0 %v3714_v2 }
  0x3d   :  { %3267 = vmatpush3.bf16.msra.mxu1 %v3715_v3  ;;  %3246 = vmatprep.subr.bf16.mxu0 %v3716_v4 }
  0x3e   :  { %3268 = vmatprep.subr.bf16.mxu1 %v3717_v5 }
  0x40   :  { %3247 = vmatpush3.bf16.msra.mxu0 %v3718_v6 }
  0x41   :  { %3269 = vmatpush3.bf16.msra.mxu1 %v3719_v7 }
  0x43   :  { %731 = vmatmul.mubr.bf16.vlgmr.msra.gmra.mrb[4].mxu0 %v3058_v10 }
  0x44   :  { %772 = vmatmul.mubr.bf16.vlgmr.msra.gmra.mrb[4].mxu1 %v3060_v14 }
  0x45   :  { %19 = vsyncpa [#allocation4], 0  ;;  %v3720_v16 = vld [vmem:[%s4645_s3] sm:$0xff]   ;;  %v3866_v18 = vmov 0.0   ;;  %v3722_v19 = vld [vmem:[%s4645_s3 + $0x8] sm:$0xff]   ;;  %vm3867_vm0 = vmmov 0  }
  0x46   :  { %v3721_v17 = vld [vmem:[%s4648_s6] sm:$0xff]   ;;  %3369 = vmatprep.subr.bf16.mxu0 %v3866_v18  ;;  %3377 = vmatprep.subr.bf16.mxu1 %v3866_v18  ;;  %v3723_v20 = vld [vmem:[%s4648_s6 + $0x8] sm:$0xff]   ;;  %vm921_vm1 = vcmask 258048   ;;  %vm806_vm2 = vcmask 261120   ;;  %vm1810_vm3 = vcmask 1042432   ;;  %v3868_v1 = vmov 0  }
  0x47   :  { %3370 = vmatpush3.bf16.msra.mxu0 %v3720_v16  ;;  %3378 = vmatpush3.bf16.msra.mxu1 %v3721_v17  ;;  %v3053_v23 = vld [vmem:[%s4644_s2] ss:$0 sm:$0xff]  ;;  %v4210_v62 = vld [vmem:[%s4646_s4 + $0x8] sm:$0xff]   ;;  %vm1038_vm4 = vcmask 1040384   ;;  %vm1070_vm5 = vcmask 253952   ;;  %vm1809_vm6 = vcmask 1041408  }
  0x48   :  { %3371 = vmatprep.subr.bf16.mxu0 %v3866_v18  ;;  %3379 = vmatprep.subr.bf16.mxu1 %v3866_v18  ;;  %v4193_v55 = vld [vmem:[%s4646_s4] sm:$0xff]   ;;  %v4215_v63 = vld [vmem:[%s4649_s7 + $0x8] sm:$0xff]   ;;  %vm1793_vm7 = vcmask 39936   ;;  %s3872_s2 = smov 96   ;;  %vm2964_vm12 = vcmask 1044480   ;;  %s3873_s20 = smov [#allocation3]  }
  0x49   :  { %3373 = vmatprep.mubr.msk.bf16.mxu0 %vm3867_vm0, %v3866_v18  ;;  %3381 = vmatprep.mubr.msk.bf16.mxu1 %vm3867_vm0, %v3866_v18  ;;  %v4198_v56 = vld [vmem:[%s4649_s7] sm:$0xff]   ;;  %s3045_s21 = sshll.u32 %s3873_s20, 4  ;;  %s3046_s21 = int_to_ptr.vmem [resolvable:$true] %s3045_s21 }
  0x4a   :  { %v3130_v10 = vld [vmem:[%s4650_s8] ss:$0 sm:$0xff]  ;;  %s3870_s8 = smov 32   ;;  %p3847_p1 = scmp.lt.s32.totalorder %s3046_s21, %s3046_s21 }
  0x4b   :  { %3372 = vmatpush3.bf16.msra.mxu0 %v3722_v19  ;;  %3380 = vmatpush3.bf16.msra.mxu1 %v3723_v20  ;;  %v3126_v11 = vld [vmem:[%s4647_s5] ss:$0 sm:$0xff]  ;;  %s3869_s5 = smov 64  }
  0x4c   :  { %3385 = vmatprep.subr.bf16.mxu0 %v3866_v18  ;;  %3393 = vmatprep.subr.bf16.mxu1 %v3866_v18 }
  0xf6   :  { %v3204_v21 = vpop.f32.mrb[0].mxu0 }
  0xf7   :  { %v3226_v22 = vpop.f32.mrb[0].mxu1  ;;  %v3205_v24 = vpop.f32.mrb[1].mxu0 }
  0xf8   :  { %v3206_v25 = vadd.f32 %v3205_v24, %v3204_v21  ;;  %v3227_v26 = vpop.f32.mrb[1].mxu1  ;;  %v3207_v27 = vpop.f32.mrb[2].mxu0 }
  0xf9   :  { %v3228_v28 = vadd.f32 %v3227_v26, %v3226_v22  ;;  %v3229_v29 = vpop.f32.mrb[2].mxu1  ;;  %v3208_v30 = vpop.f32.mrb[3].mxu0 }
  0xfa   :  { %v651_v31 = vadd.f32 %v3206_v25, %v3053_v23  ;;  %v3209_v32 = vadd.f32 %v3208_v30, %v3207_v27  ;;  %v3230_v33 = vpop.f32.mrb[3].mxu1 }
  0xfb   :  { %v3231_v34 = vadd.f32 %v3230_v33, %v3229_v29 }
  0xfc   :  { %v692_v35 = vadd.f32 %v3228_v28, %v651_v31  ;;  %v654_v36 = vadd.f32 %v3209_v32, %v3053_v23 }
  0xfe   :  { %v695_v37 = vadd.f32 %v3231_v34, %v654_v36 }
 0x116   :  { %v3248_v38 = vpop.f32.mrb[4].mxu0 }
 0x117   :  { %v3270_v39 = vpop.f32.mrb[4].mxu1  ;;  %v3249_v40 = vpop.f32.mrb[5].mxu0 }
 0x118   :  { %v3250_v41 = vadd.f32 %v3249_v40, %v3248_v38  ;;  %v3271_v42 = vpop.f32.mrb[5].mxu1  ;;  %v3251_v43 = vpop.f32.mrb[6].mxu0 }
 0x119   :  { %v3272_v44 = vadd.f32 %v3271_v42, %v3270_v39  ;;  %v3273_v45 = vpop.f32.mrb[6].mxu1  ;;  %v3252_v46 = vpop.f32.mrb[7].mxu0 }
 0x11a   :  { %v733_v47 = vadd.f32 %v3250_v41, %v692_v35  ;;  %v3253_v48 = vadd.f32 %v3252_v46, %v3251_v43  ;;  %v3274_v49 = vpop.f32.mrb[7].mxu1 }
 0x11b   :  { %v3275_v50 = vadd.f32 %v3274_v49, %v3273_v45 }
 0x11c   :  { %v774_v51 = vadd.f32 %v3272_v44, %v733_v47  ;;  %v736_v52 = vadd.f32 %v3253_v48, %v695_v37 }
 0x11e   :  { %v780_v53 = vmax.f32 %v774_v51, 0.0  ;;  %v777_v54 = vadd.f32 %v3275_v50, %v736_v52 }
 0x120   :  { %v782_v57 = vpack.c.bf16 %v780_v53, %v780_v53  ;;  %922 = vst.msk [vmem:[#allocation2] sm:$0x1f] %vm921_vm1, %v780_v53  ;;  %v781_v58 = vmax.f32 %v777_v54, 0.0  ;;  %v1991_v61 = vrot.slane %v780_v53, 5 }
 0x122   :  { %v4201_v59 = vpack.c.bf16 %v781_v58, %v780_v53  ;;  %v1992_v60 = vrot.slane %v781_v58, 5  ;;  %3374 = vmatmul.mubr.msk.bf16.vlgmr.msra.gmra.mrb[8].mxu0 %vm806_vm2, %v782_v57  ;;  %3382 = vmatmul.mubr.msk.bf16.vlgmr.msra.gmra.mrb[8].mxu1 %vm806_vm2, %v782_v57 }
 0x123   :  { %3386 = vmatpush3.bf16.msra.mxu0 %v4193_v55  ;;  %3394 = vmatpush3.bf16.msra.mxu1 %v4198_v56 }
 0x124   :  { %3387 = vmatprep.subr.bf16.mxu0 %v3866_v18  ;;  %3395 = vmatprep.subr.bf16.mxu1 %v3866_v18  ;;  %v4220_v0 = vsel %vm1810_vm3, %v1991_v61, %v1992_v60 }
 0x125   :  { %3389 = vmatprep.mubr.msk.bf16.mxu0 %vm3867_vm0, %v3866_v18  ;;  %3397 = vmatprep.mubr.msk.bf16.mxu1 %vm3867_vm0, %v3866_v18 }
 0x127   :  { %3388 = vmatpush3.bf16.msra.mxu0 %v4210_v62  ;;  %3396 = vmatpush3.bf16.msra.mxu1 %v4215_v63 }
 0x128   :  { %3401 = vmatprep.subr.bf16.mxu0 %v3866_v18  ;;  %3409 = vmatprep.subr.bf16.mxu1 %v3866_v18 }
 0x12a   :  { %3390 = vmatmul.mubr.bf16.vlgmr.msra.gmra.mrb[12].mxu0 %v3868_v1  ;;  %3398 = vmatmul.mubr.bf16.vlgmr.msra.gmra.mrb[12].mxu1 %v3868_v1 }
 0x12b   :  { %3402 = vmatpush3.bf16.msra.mxu0 %v4193_v55  ;;  %3410 = vmatpush3.bf16.msra.mxu1 %v4198_v56 }
 0x12c   :  { %3403 = vmatprep.subr.bf16.mxu0 %v3866_v18  ;;  %3411 = vmatprep.subr.bf16.mxu1 %v3866_v18 }
 0x12d   :  { %3405 = vmatprep.mubr.msk.bf16.mxu0 %vm3867_vm0, %v3866_v18  ;;  %3413 = vmatprep.mubr.msk.bf16.mxu1 %vm3867_vm0, %v3866_v18 }
 0x12f   :  { %3404 = vmatpush3.bf16.msra.mxu0 %v4210_v62  ;;  %3412 = vmatpush3.bf16.msra.mxu1 %v4215_v63 }
 0x130   :  { %3417 = vmatprep.subr.bf16.mxu0 %v3866_v18  ;;  %3425 = vmatprep.subr.bf16.mxu1 %v3866_v18 }
 0x1f5   :  { %v844_v2 = vpop.f32.mrb[8].mxu0  ;;  %v907_v3 = vpop.f32.mrb[8].mxu1 }
 0x1f6   :  { %v3375_v4 = vpop.f32.mrb[9].mxu0  ;;  %v3383_v5 = vpop.f32.mrb[9].mxu1  ;;  %v4248_v14 = vadd.f32 %v3130_v10, %v907_v3  ;;  %v4250_v21 = vadd.f32 %v3126_v11, %v844_v2 }
 0x1f7   :  { %v847_v6 = vpop.f32.mrb[10].mxu0  ;;  %v910_v7 = vpop.f32.mrb[10].mxu1 }
 0x1f8   :  { %v3376_v8 = vpop.f32.mrb[11].mxu0  ;;  %v3384_v9 = vpop.f32.mrb[11].mxu1 }
 0x1fd   :  { %v972_v12 = vpop.f32.mrb[12].mxu0  ;;  %v1025_v13 = vpop.f32.mrb[12].mxu1 }
 0x1fe   :  { %v1032_v15 = vrot.slane %v1025_v13, 4  ;;  %v3399_v16 = vpop.f32.mrb[13].mxu1  ;;  %v3391_v17 = vpop.f32.mrb[13].mxu0  ;;  %v978_v25 = vadd.f32 %v972_v12, %v4250_v21 }
 0x1ff   :  { %v1028_v19 = vpop.f32.mrb[14].mxu1  ;;  %v975_v20 = vpop.f32.mrb[14].mxu0 }
 0x200   :  { %v1034_v22 = vadd.f32 %v1032_v15, %v4248_v14  ;;  %v3400_v23 = vpop.f32.mrb[15].mxu1  ;;  %v3392_v24 = vpop.f32.mrb[15].mxu0 }
 0x202   :  { %v1036_v26 = vrot.slane %v1034_v22, 3 }
 0x204   :  { %v1039_v27 = vsel %vm1038_vm4, %v978_v25, %v1036_v26 }
 0x205   :  { %3734 = vtanh.f32 %v1039_v27  ;;  %v3138_v29 = vmul.f32 -1.442695, %v1039_v27 }
 0x207   :  { %3736 = vpow2.f32 %v3138_v29 }
 0x20f   :  { %v3735_v28 = vpop.eup %3734 }
 0x210   :  { %1049 = vrot.lane.b32.xlu0 %v3735_v28, %s3869_s5 }
 0x211   :  { %v3737_v30 = vpop.eup %3736 }
 0x212   :  { %v1043_v31 = vadd.f32 1.0, %v3737_v30 }
 0x214   :  { %3738 = vrcp.f32 %v1043_v31 }
 0x21e   :  { %v3739_v32 = vpop.eup %3738 }
 0x21f   :  { %v1047_v35 = vmul.f32 0.0, %v3739_v32 }
 0x282   :  { %v1050_v33 = vpop.permute.xlu0 %1049 }
 0x283   :  { %v1052_v34 = vmul.f32 %v3739_v32, %v1050_v33 }
 0x285   :  { %1054 = vrot.lane.b32.xlu0 %v1052_v34, %s3870_s8 }
 0x2f7   :  { %v1055_v36 = vpop.permute.xlu0 %1054 }
 0x2f8   :  { %v1057_v37 = vadd.f32 %v1055_v36, %v1047_v35 }
 0x2fa   :  { %3740 = vtanh.f32 %v1057_v37 }
 0x304   :  { %v3741_v38 = vpop.eup %3740 }
 0x305   :  { %1060 = vrot.lane.b32.xlu1 %v3741_v38, %s3869_s5 }
 0x377   :  { %v1061_v39 = vpop.permute.xlu1 %1060 }
 0x378   :  { %v4258_v40 = vmul.f32 %v3739_v32, %v1061_v39 }
 0x37a   :  { %v1079_v41 = vpack.c.bf16 %v4258_v40, %v4258_v40 }
 0x37c   :  { %1081 = vrot.lane.b32.xlu1 %v1079_v41, %s3870_s8  ;;  %v1131_v42 = vshrl.u32 %v1079_v41, 16 }
 0x37e   :  { %1133 = vrot.lane.b32.xlu0 %v1131_v42, %s3870_s8 }
 0x3ee   :  { %v1082_v43 = vpop.permute.xlu1 %1081 }
 0x3ef   :  { %3406 = vmatmul.mubr.msk.bf16.vlgmr.msra.gmra.mrb[16].mxu0 %vm806_vm2, %v1082_v43 }
 0x3f0   :  { %v1134_v44 = vpop.permute.xlu0 %1133  ;;  %3418 = vmatpush3.bf16.msra.mxu0 %v4193_v55  ;;  %3421 = vmatprep.mubr.msk.bf16.mxu0 %vm3867_vm0, %v3866_v18 }
 0x3f1   :  { %3414 = vmatmul.mubr.msk.bf16.vlgmr.msra.gmra.mrb[16].mxu1 %vm806_vm2, %v1134_v44  ;;  %3419 = vmatprep.subr.bf16.mxu0 %v3866_v18 }
 0x3f2   :  { %3426 = vmatpush3.bf16.msra.mxu1 %v4198_v56  ;;  %3429 = vmatprep.mubr.msk.bf16.mxu1 %vm3867_vm0, %v3866_v18 }
 0x3f3   :  { %3427 = vmatprep.subr.bf16.mxu1 %v3866_v18 }
 0x3f4   :  { %3420 = vmatpush3.bf16.msra.mxu0 %v4210_v62 }
 0x3f5   :  { %3433 = vmatprep.subr.bf16.mxu0 %v3866_v18 }
 0x3f6   :  { %3428 = vmatpush3.bf16.msra.mxu1 %v4215_v63 }
 0x3f7   :  { %3441 = vmatprep.subr.bf16.mxu1 %v3866_v18 }
 0x4c2   :  { %v1120_v45 = vpop.f32.mrb[16].mxu0 }
 0x4c3   :  { %v1127_v46 = vrot.slane %v1120_v45, 7  ;;  %v3407_v47 = vpop.f32.mrb[17].mxu0 }
 0x4c4   :  { %v1123_v48 = vpop.f32.mrb[18].mxu0  ;;  %v1172_v49 = vpop.f32.mrb[16].mxu1 }
 0x4c5   :  { %v1129_v50 = vadd.f32 %v1127_v46, %v4250_v21  ;;  %v1179_v51 = vrot.slane %v1172_v49, 5  ;;  %v3408_v52 = vpop.f32.mrb[19].mxu0  ;;  %v3415_v53 = vpop.f32.mrb[17].mxu1 }
 0x4c6   :  { %v1175_v54 = vpop.f32.mrb[18].mxu1 }
 0x4c7   :  { %v1181_v57 = vadd.f32 %v1179_v51, %v4248_v14  ;;  %v3416_v58 = vpop.f32.mrb[19].mxu1  ;;  %v1183_v60 = vrot.slane %v1129_v50, 1 }
 0x4c9   :  { %v1186_v61 = vrot.slane %v1181_v57, 2 }
 0x4cb   :  { %v1188_v1 = vsel %vm1038_vm4, %v1183_v60, %v1186_v61 }
 0x4cc   :  { %3742 = vtanh.f32 %v1188_v1  ;;  %v3141_v3 = vmul.f32 -1.442695, %v1188_v1 }
 0x4ce   :  { %3744 = vpow2.f32 %v3141_v3 }
 0x4d6   :  { %v3743_v2 = vpop.eup %3742 }
 0x4d7   :  { %1198 = vrot.lane.b32.xlu1 %v3743_v2, %s3869_s5 }
 0x4d8   :  { %v3745_v4 = vpop.eup %3744 }
 0x4d9   :  { %v1192_v5 = vadd.f32 1.0, %v3745_v4 }
 0x4db   :  { %3746 = vrcp.f32 %v1192_v5 }
 0x4e5   :  { %v3747_v6 = vpop.eup %3746 }
 0x4e6   :  { %v1196_v9 = vmul.f32 %v3747_v6, %v1057_v37 }
 0x549   :  { %v1199_v7 = vpop.permute.xlu1 %1198 }
 0x54a   :  { %v1201_v8 = vmul.f32 %v3747_v6, %v1199_v7 }
 0x54c   :  { %1203 = vrot.lane.b32.xlu0 %v1201_v8, %s3870_s8 }
 0x5be   :  { %v1204_v10 = vpop.permute.xlu0 %1203 }
 0x5bf   :  { %v1206_v11 = vadd.f32 %v1204_v10, %v1196_v9 }
 0x5c1   :  { %3748 = vtanh.f32 %v1206_v11 }
 0x5cb   :  { %v3749_v12 = vpop.eup %3748 }
 0x5cc   :  { %1209 = vrot.lane.b32.xlu1 %v3749_v12, %s3869_s5 }
 0x63e   :  { %v1210_v13 = vpop.permute.xlu1 %1209 }
 0x63f   :  { %v4284_v15 = vmul.f32 %v3747_v6, %v1210_v13 }
 0x641   :  { %v1227_v16 = vpack.c.bf16 %v4284_v15, %v4284_v15 }
 0x643   :  { %1229 = vrot.lane.b32.xlu0 %v1227_v16, %s3870_s8  ;;  %v1279_v17 = vshrl.u32 %v1227_v16, 16 }
 0x645   :  { %1281 = vrot.lane.b32.xlu1 %v1279_v17, %s3870_s8 }
 0x6b5   :  { %v1230_v19 = vpop.permute.xlu0 %1229 }
 0x6b6   :  { %3422 = vmatmul.mubr.msk.bf16.vlgmr.msra.gmra.mrb[20].mxu0 %vm806_vm2, %v1230_v19 }
 0x6b7   :  { %v1282_v20 = vpop.permute.xlu1 %1281  ;;  %3434 = vmatpush3.bf16.msra.mxu0 %v4193_v55  ;;  %3437 = vmatprep.mubr.msk.bf16.mxu0 %vm3867_vm0, %v3866_v18 }
 0x6b8   :  { %3430 = vmatmul.mubr.msk.bf16.vlgmr.msra.gmra.mrb[20].mxu1 %vm806_vm2, %v1282_v20  ;;  %3435 = vmatprep.subr.bf16.mxu0 %v3866_v18 }
 0x6b9   :  { %3442 = vmatpush3.bf16.msra.mxu1 %v4198_v56  ;;  %3445 = vmatprep.mubr.msk.bf16.mxu1 %vm3867_vm0, %v3866_v18 }
 0x6ba   :  { %3443 = vmatprep.subr.bf16.mxu1 %v3866_v18 }
 0x6bb   :  { %3436 = vmatpush3.bf16.msra.mxu0 %v4210_v62 }
 0x6bc   :  { %3449 = vmatprep.subr.bf16.mxu0 %v3866_v18 }
 0x6bd   :  { %3444 = vmatpush3.bf16.msra.mxu1 %v4215_v63 }
 0x6be   :  { %3457 = vmatprep.subr.bf16.mxu1 %v3866_v18 }
 0x789   :  { %v1268_v22 = vpop.f32.mrb[20].mxu0 }
 0x78a   :  { %v1275_v23 = vrot.slane %v1268_v22, 6  ;;  %v3423_v24 = vpop.f32.mrb[21].mxu0 }
 0x78b   :  { %v1271_v25 = vpop.f32.mrb[22].mxu0  ;;  %v1320_v26 = vpop.f32.mrb[20].mxu1 }
 0x78c   :  { %v1277_v27 = vadd.f32 %v1275_v23, %v4250_v21  ;;  %v1327_v28 = vrot.slane %v1320_v26, 6  ;;  %v3424_v29 = vpop.f32.mrb[23].mxu0  ;;  %v3431_v30 = vpop.f32.mrb[21].mxu1  ;;  %v3728_v26 = vld [vmem:[%s4651_s9] sm:$0xff]  }
 0x78d   :  { %v1323_v31 = vpop.f32.mrb[22].mxu1 }
 0x78e   :  { %v1329_v32 = vadd.f32 %v1327_v28, %v4248_v14  ;;  %v3432_v33 = vpop.f32.mrb[23].mxu1  ;;  %v1331_v34 = vrot.slane %v1277_v27, 2  ;;  %v1680_v27 = vshrl.u32 %v4201_v59, 16  ;;  %v1683_v28 = vshll.u32 %v4201_v59, 16  ;;  %v3729_v31 = vld [vmem:[%s4651_s9 + $0x8] sm:$0xff]  }
 0x790   :  { %v1334_v35 = vrot.slane %v1329_v32, 1  ;;  %v1682_v32 = vrot.slane %v1680_v27, 2  ;;  %v1685_v33 = vrot.slane %v1683_v28, 3 }
 0x792   :  { %v1336_v36 = vsel %vm1038_vm4, %v1331_v34, %v1334_v35  ;;  %v4360_v59 = vor.u32 %v1685_v33, %v1682_v32 }
 0x793   :  { %3750 = vtanh.f32 %v1336_v36  ;;  %v3144_v38 = vmul.f32 -1.442695, %v1336_v36 }
 0x795   :  { %3752 = vpow2.f32 %v3144_v38 }
 0x79d   :  { %v3751_v37 = vpop.eup %3750 }
 0x79e   :  { %1346 = vrot.lane.b32.xlu0 %v3751_v37, %s3869_s5 }
 0x79f   :  { %v3753_v39 = vpop.eup %3752 }
 0x7a0   :  { %v1340_v41 = vadd.f32 1.0, %v3753_v39 }
 0x7a2   :  { %3754 = vrcp.f32 %v1340_v41 }
 0x7ac   :  { %v3755_v42 = vpop.eup %3754 }
 0x7ad   :  { %v1344_v45 = vmul.f32 %v3755_v42, %v1206_v11 }
 0x810   :  { %v1347_v43 = vpop.permute.xlu0 %1346 }
 0x811   :  { %v1349_v44 = vmul.f32 %v3755_v42, %v1347_v43 }
 0x813   :  { %1351 = vrot.lane.b32.xlu1 %v1349_v44, %s3870_s8 }
 0x885   :  { %v1352_v46 = vpop.permute.xlu1 %1351 }
 0x886   :  { %v1354_v47 = vadd.f32 %v1352_v46, %v1344_v45 }
 0x888   :  { %3756 = vtanh.f32 %v1354_v47 }
 0x892   :  { %v3757_v48 = vpop.eup %3756 }
 0x893   :  { %1357 = vrot.lane.b32.xlu0 %v3757_v48, %s3869_s5 }
 0x905   :  { %v1358_v49 = vpop.permute.xlu0 %1357 }
 0x906   :  { %v4310_v50 = vmul.f32 %v3755_v42, %v1358_v49 }
 0x908   :  { %v1375_v51 = vpack.c.bf16 %v4310_v50, %v4310_v50 }
 0x90a   :  { %1377 = vrot.lane.b32.xlu1 %v1375_v51, %s3870_s8  ;;  %v1427_v52 = vshrl.u32 %v1375_v51, 16 }
 0x90c   :  { %1429 = vrot.lane.b32.xlu0 %v1427_v52, %s3870_s8 }
 0x97c   :  { %v1378_v53 = vpop.permute.xlu1 %1377 }
 0x97d   :  { %3438 = vmatmul.mubr.msk.bf16.vlgmr.msra.gmra.mrb[24].mxu0 %vm806_vm2, %v1378_v53 }
 0x97e   :  { %v1430_v54 = vpop.permute.xlu0 %1429  ;;  %3450 = vmatpush3.bf16.msra.mxu0 %v4193_v55  ;;  %3453 = vmatprep.mubr.msk.bf16.mxu0 %vm3867_vm0, %v3866_v18 }
 0x97f   :  { %3446 = vmatmul.mubr.msk.bf16.vlgmr.msra.gmra.mrb[24].mxu1 %vm806_vm2, %v1430_v54  ;;  %3451 = vmatprep.subr.bf16.mxu0 %v3866_v18 }
 0x980   :  { %3458 = vmatpush3.bf16.msra.mxu1 %v4198_v56  ;;  %3461 = vmatprep.mubr.msk.bf16.mxu1 %vm3867_vm0, %v3866_v18 }
 0x981   :  { %3459 = vmatprep.subr.bf16.mxu1 %v3866_v18 }
 0x982   :  { %3452 = vmatpush3.bf16.msra.mxu0 %v4210_v62 }
 0x983   :  { %3465 = vmatprep.subr.bf16.mxu0 %v3866_v18 }
 0x984   :  { %3460 = vmatpush3.bf16.msra.mxu1 %v4215_v63 }
 0x985   :  { %3473 = vmatprep.subr.bf16.mxu1 %v3866_v18 }
 0xa50   :  { %v1416_v55 = vpop.f32.mrb[24].mxu0 }
 0xa51   :  { %v1423_v57 = vrot.slane %v1416_v55, 5  ;;  %v3439_v58 = vpop.f32.mrb[25].mxu0 }
 0xa52   :  { %v1419_v60 = vpop.f32.mrb[26].mxu0  ;;  %v1468_v61 = vpop.f32.mrb[24].mxu1 }
 0xa53   :  { %v1425_v56 = vadd.f32 %v1423_v57, %v4250_v21  ;;  %v1475_v1 = vrot.slane %v1468_v61, 7  ;;  %v3440_v2 = vpop.f32.mrb[27].mxu0  ;;  %v3447_v3 = vpop.f32.mrb[25].mxu1 }
 0xa54   :  { %v1471_v4 = vpop.f32.mrb[26].mxu1  ;;  %v1064_v2 = vld [vmem:[#allocation2] sm:$0x1] }
 0xa55   :  { %v1479_v5 = vrot.slane %v1425_v56, 3  ;;  %v1477_v62 = vadd.f32 %v1475_v1, %v4248_v14  ;;  %v3448_v6 = vpop.f32.mrb[27].mxu1 }
 0xa57   :  { %v1481_v7 = vsel %vm1038_vm4, %v1479_v5, %v1477_v62  ;;  %v1213_v5 = vld [vmem:[#allocation2 + $0x1] sm:$0x1] }
 0xa58   :  { %3758 = vtanh.f32 %v1481_v7  ;;  %v3147_v8 = vmul.f32 -1.442695, %v1481_v7  ;;  %v1361_v7 = vld [vmem:[#allocation2 + $0x2] sm:$0x1] }
 0xa5a   :  { %3760 = vpow2.f32 %v3147_v8 }
 0xa62   :  { %v3759_v63 = vpop.eup %3758 }
 0xa63   :  { %1491 = vrot.lane.b32.xlu1 %v3759_v63, %s3869_s5 }
 0xa64   :  { %v3761_v9 = vpop.eup %3760 }
 0xa65   :  { %v1485_v10 = vadd.f32 1.0, %v3761_v9 }
 0xa67   :  { %3762 = vrcp.f32 %v1485_v10  ;;  %v1073_v10 = vrot.slane %v4258_v40, 1 }
 0xa71   :  { %v3763_v11 = vpop.eup %3762 }
 0xa72   :  { %v1489_v16 = vmul.f32 %v3763_v11, %v1354_v47 }
 0xad5   :  { %v1492_v12 = vpop.permute.xlu1 %1491 }
 0xad6   :  { %v1494_v13 = vmul.f32 %v3763_v11, %v1492_v12  ;;  %v1369_v12 = vrot.slane %v4310_v50, 1 }
 0xad8   :  { %1496 = vrot.lane.b32.xlu0 %v1494_v13, %s3870_s8 }
 0xb4a   :  { %v1497_v17 = vpop.permute.xlu0 %1496 }
 0xb4b   :  { %v4335_v19 = vadd.f32 %v1497_v17, %v1489_v16 }
 0xb4d   :  { %3764 = vtanh.f32 %v4335_v19 }
 0xb57   :  { %v3765_v20 = vpop.eup %3764 }
 0xb58   :  { %1502 = vrot.lane.b32.xlu1 %v3765_v20, %s3869_s5 }
 0xbca   :  { %v1503_v22 = vpop.permute.xlu1 %1502 }
 0xbcb   :  { %v4339_v23 = vmul.f32 %v3763_v11, %v1503_v22  ;;  %v1221_v11 = vrot.slane %v4284_v15, 1 }
 0xbcd   :  { %v1520_v24 = vpack.c.bf16 %v4339_v23, %v4339_v23  ;;  %v1514_v13 = vrot.slane %v4339_v23, 1 }
 0xbcf   :  { %1522 = vrot.lane.b32.xlu0 %v1520_v24, %s3870_s8  ;;  %v1572_v25 = vshrl.u32 %v1520_v24, 16 }
 0xbd1   :  { %1574 = vrot.lane.b32.xlu1 %v1572_v25, %s3870_s8 }
 0xc41   :  { %v1523_v29 = vpop.permute.xlu0 %1522 }
 0xc42   :  { %3454 = vmatmul.mubr.msk.bf16.vlgmr.msra.gmra.mrb[28].mxu0 %vm806_vm2, %v1523_v29 }
 0xc43   :  { %3466 = vmatpush3.bf16.msra.mxu0 %v3728_v26  ;;  %v1575_v30 = vpop.permute.xlu1 %1574  ;;  %3469 = vmatprep.mubr.msk.bf16.mxu0 %vm3867_vm0, %v3866_v18 }
 0xc44   :  { %3462 = vmatmul.mubr.msk.bf16.vlgmr.msra.gmra.mrb[28].mxu1 %vm806_vm2, %v1575_v30  ;;  %3467 = vmatprep.subr.bf16.mxu0 %v3866_v18 }
 0xc45   :  { %3475 = vmatprep.mubr.msk.bf16.mxu1 %vm3867_vm0, %v3866_v18 }
 0xc47   :  { %3468 = vmatpush3.bf16.msra.mxu0 %v3729_v31 }
 0xc48   :  { %3479 = vmatprep.subr.bf16.mxu0 %v3866_v18 }
 0xc4a   :  { %3470 = vmatmul.mubr.msk.bf16.vlgmr.msra.gmra.mrb[32].mxu0 %vm806_vm2, %v4360_v59 }
 0xc4b   :  { %3481 = vmatprep.mubr.msk.bf16.mxu0 %vm3867_vm0, %v3866_v18 }
 0xd15   :  { %v1561_v34 = vpop.f32.mrb[28].mxu0 }
 0xd16   :  { %v1568_v35 = vrot.slane %v1561_v34, 4  ;;  %v3455_v36 = vpop.f32.mrb[29].mxu0 }
 0xd17   :  { %v1564_v37 = vpop.f32.mrb[30].mxu0  ;;  %v1613_v38 = vpop.f32.mrb[28].mxu1 }
 0xd18   :  { %v1570_v39 = vadd.f32 %v1568_v35, %v4250_v21  ;;  %v1619_v41 = vadd.f32 %v1613_v38, %v4248_v14  ;;  %v3456_v42 = vpop.f32.mrb[31].mxu0  ;;  %v3463_v43 = vpop.f32.mrb[29].mxu1 }
 0xd19   :  { %v1616_v44 = vpop.f32.mrb[30].mxu1 }
 0xd1a   :  { %v1621_v45 = vrot.slane %v1570_v39, 4  ;;  %v1624_v46 = vrot.slane %v1619_v41, 7  ;;  %v3464_v47 = vpop.f32.mrb[31].mxu1  ;;  %v3871_v39 = vmov 65535  }
 0xd1b   :  { %v1811_v41 = vsel %vm1809_vm6, 4294967295, %v3871_v39 }
 0xd1c   :  { %v1626_v48 = vsel %vm1038_vm4, %v1621_v45, %v1624_v46  ;;  %v1812_v43 = vsel %vm1810_vm3, %v1811_v41, 0 }
 0xd1d   :  { %3766 = vtanh.f32 %v1626_v48  ;;  %v4370_v49 = vpop.f32.mrb[32].mxu0  ;;  %v3150_v21 = vmul.f32 -1.442695, %v1626_v48 }
 0xd1e   :  { %v3471_v51 = vpop.f32.mrb[33].mxu0 }
 0xd1f   :  { %v1739_v52 = vpop.f32.mrb[34].mxu0  ;;  %3768 = vpow2.f32 %v3150_v21 }
 0xd20   :  { %v3472_v53 = vpop.f32.mrb[35].mxu0 }
 0xd27   :  { %v3767_v54 = vpop.eup %3766 }
 0xd28   :  { %1636 = vrot.lane.b32.xlu0 %v3767_v54, %s3869_s5 }
 0xd29   :  { %v3769_v14 = vpop.eup %3768 }
 0xd2a   :  { %v1630_v55 = vadd.f32 1.0, %v3769_v14 }
 0xd2c   :  { %3770 = vrcp.f32 %v1630_v55 }
 0xd36   :  { %v3771_v57 = vpop.eup %3770 }
 0xd37   :  { %v1634_v61 = vmul.f32 %v3771_v57, %v4335_v19 }
 0xd9a   :  { %v1637_v58 = vpop.permute.xlu0 %1636 }
 0xd9b   :  { %v1639_v60 = vmul.f32 %v3771_v57, %v1637_v58  ;;  %v4427_v58 = vld [vmem:[%s4652_s10] sm:$0xff]  }
 0xd9d   :  { %1641 = vrot.lane.b32.xlu1 %v1639_v60, %s3870_s8 }
 0xda1   :  { %1066 = vrot.lane.b32.xlu1 %v4258_v40, %s3870_s8  ;;  %v1072_v40 = vld [vmem:[#allocation2 + $0x4] sm:$0x1] }
 0xda5   :  { %1215 = vrot.lane.b32.xlu1 %v4284_v15, %s3870_s8  ;;  %v1220_v15 = vld [vmem:[#allocation2 + $0x3] sm:$0x1] }
 0xda9   :  { %1363 = vrot.lane.b32.xlu1 %v4310_v50, %s3870_s8 }
 0xdad   :  { %1508 = vrot.lane.b32.xlu1 %v4339_v23, %s3870_s8 }
 0xe0f   :  { %v1642_v56 = vpop.permute.xlu1 %1641 }
 0xe10   :  { %v1644_v1 = vadd.f32 %v1642_v56, %v1634_v61 }
 0xe12   :  { %3772 = vtanh.f32 %v1644_v1 }
 0xe13   :  { %v1067_v3 = vpop.permute.xlu1 %1066 }
 0xe14   :  { %v1069_v4 = vadd.f32 %v1067_v3, %v1064_v2  ;;  %v4439_v2 = vld [vmem:[%s4652_s10 + $0x8] sm:$0xff]  }
 0xe16   :  { %1071 = vst.msk [vmem:[#allocation2] sm:$0x1] %vm1070_vm5, %v1069_v4  ;;  %v4446_v4 = vld [vmem:[%s4653_s11] sm:$0xff]  }
 0xe17   :  { %v1216_v62 = vpop.permute.xlu1 %1215 }
 0xe18   :  { %v1218_v6 = vadd.f32 %v1216_v62, %v1213_v5 }
 0xe1a   :  { %1219 = vst.msk [vmem:[#allocation2 + $0x1] sm:$0x1] %vm1070_vm5, %v1218_v6 }
 0xe1b   :  { %v1364_v63 = vpop.permute.xlu1 %1363 }
 0xe1c   :  { %v3773_v8 = vpop.eup %3772  ;;  %v1366_v9 = vadd.f32 %v1364_v63, %v1361_v7  ;;  %v4453_v63 = vld [vmem:[%s4653_s11 + $0x8] sm:$0xff]  }
 0xe1d   :  { %1647 = vrot.lane.b32.xlu0 %v3773_v8, %s3869_s5  ;;  %v1658_v36 = vld [vmem:[#allocation2] sm:$0x1] }
 0xe1e   :  { %1367 = vst.msk [vmem:[#allocation2 + $0x2] sm:$0x1] %vm1070_vm5, %v1366_v9  ;;  %v3151_v8 = vld [vmem:[%s4654_s12] ss:$0 sm:$0xff] }
 0xe1f   :  { %v1509_v30 = vpop.permute.xlu1 %1508  ;;  %v4472_v9 = vadd.f32 %v3151_v8, %v4370_v49 }
 0xe21   :  { %1074 = vrot.lane.b32.xlu0 %v1073_v10, %s3870_s8  ;;  %v1513_v27 = vld [vmem:[#allocation2 + $0x1] sm:$0x1] }
 0xe25   :  { %1222 = vrot.lane.b32.xlu0 %v1221_v11, %s3870_s8  ;;  %v1368_v23 = vld [vmem:[#allocation2 + $0x2] sm:$0x1] }
 0xe29   :  { %1370 = vrot.lane.b32.xlu0 %v1369_v12, %s3870_s8 }
 0xe2d   :  { %1515 = vrot.lane.b32.xlu0 %v1514_v13, %s3870_s8 }
 0xe8f   :  { %v1648_v16 = vpop.permute.xlu0 %1647 }
 0xe90   :  { %v1650_v17 = vmul.f32 %v3771_v57, %v1648_v16 }
 0xe92   :  { %v1659_v19 = vrot.slane %v1650_v17, 1  ;;  %1653 = vrot.lane.b32.xlu1 %v1650_v17, %s3870_s8 }
 0xe93   :  { %v1075_v20 = vpop.permute.xlu0 %1074 }
 0xe94   :  { %v1077_v22 = vadd.f32 %v1075_v20, %v1072_v40  ;;  %1660 = vrot.lane.b32.xlu0 %v1659_v19, %s3870_s8 }
 0xe96   :  { %1078 = vst.msk [vmem:[#allocation2 + $0x4] sm:$0x1] %vm1070_vm5, %v1077_v22 }
 0xe97   :  { %v1223_v50 = vpop.permute.xlu0 %1222 }
 0xe98   :  { %v1225_v24 = vadd.f32 %v1223_v50, %v1220_v15 }
 0xe9a   :  { %1226 = vst.msk [vmem:[#allocation2 + $0x3] sm:$0x1] %vm1070_vm5, %v1225_v24 }
 0xe9b   :  { %v1371_v25 = vpop.permute.xlu0 %1370 }
 0xe9c   :  { %v1373_v26 = vadd.f32 %v1371_v25, %v1368_v23 }
 0xe9d   :  { %v1651_v34 = vld [vmem:[#allocation2 + $0x4] sm:$0x1] }
 0xe9e   :  { %1374 = vst.msk [vmem:[#allocation2 + $0x2] sm:$0x1] %vm1070_vm5, %v1373_v26 }
 0xe9f   :  { %v1516_v28 = vpop.permute.xlu0 %1515 }
 0xea0   :  { %v1518_v29 = vadd.f32 %v1516_v28, %v1513_v27 }
 0xea1   :  { %v1506_v31 = vld [vmem:[#allocation2 + $0x3] sm:$0x1] }
 0xea2   :  { %v1511_v32 = vadd.f32 %v1509_v30, %v1506_v31  ;;  %1519 = vst.msk [vmem:[#allocation2 + $0x1] sm:$0x1] %vm1070_vm5, %v1518_v29 }
 0xea4   :  { %1512 = vst.msk [vmem:[#allocation2 + $0x3] sm:$0x1] %vm1070_vm5, %v1511_v32 }
 0xf04   :  { %v1654_v33 = vpop.permute.xlu1 %1653 }
 0xf05   :  { %v1656_v35 = vadd.f32 %v1654_v33, %v1651_v34 }
 0xf06   :  { %v1661_v37 = vpop.permute.xlu0 %1660 }
 0xf07   :  { %1657 = vst.msk [vmem:[#allocation2 + $0x4] sm:$0x1] %vm1070_vm5, %v1656_v35  ;;  %v1663_v38 = vadd.f32 %v1661_v37, %v1658_v36 }
 0xf09   :  { %1664 = vst.msk [vmem:[#allocation2] sm:$0x1] %vm1070_vm5, %v1663_v38 }
 0xf10   :  { %v4404_v42 = vld [vmem:[#allocation2] sm:$0x1f] }
 0xf11   :  { %v1666_v44 = vpack.c.bf16 %v4404_v42, %v4404_v42 }
 0xf13   :  { %v4410_v45 = vsel %vm806_vm2, %v1666_v44, 0  ;;  %v4412_v46 = vand.u32 %v1812_v43, %v1666_v44 }
 0xf14   :  { %3474 = vmatpush3.bf16.xpose.msra.mxu1 %v4410_v45 }
 0xf15   :  { %3480 = vmatpush3.bf16.msra.mxu0 %v4412_v46  ;;  %3485 = vmatprep.subr.bf16.mxu1 %v3866_v18 }
 0xf16   :  { %3501 = vmatprep.subr.bf16.mxu0 %v3866_v18 }
 0xf1b   :  { %3476 = vmatmul.mubr.msk.bf16.vlgmr.msra.gmra.mrb[32].mxu1 %vm806_vm2, %v4360_v59 }
 0xf1c   :  { %3489 = vmatprep.mubr.msk.bf16.mxu1 %vm3867_vm0, %v3866_v18  ;;  %3486 = vmatpush3.bf16.msra.mxu1 %v4427_v58 }
 0xf1d   :  { %3487 = vmatprep.subr.bf16.mxu1 %v3866_v18 }
 0xf20   :  { %3488 = vmatpush3.bf16.msra.mxu1 %v4439_v2 }
 0xf21   :  { %3493 = vmatprep.subr.bf16.mxu1 %v3866_v18 }
 0xfee   :  { %v1787_v47 = vpop.f32.mrb[32].mxu1 }
 0xfef   :  { %v3477_v48 = vpop.f32.mrb[33].mxu1  ;;  %v1794_v51 = vsel %vm1793_vm7, %v1787_v47, -inf }
 0xff0   :  { %1795 = vmax.xlane.f32.xlu1 %v1794_v51  ;;  %v1790_v52 = vpop.f32.mrb[34].mxu1 }
 0xff1   :  { %v3478_v53 = vpop.f32.mrb[35].mxu1 }
0x107d   :  { %v1796_v54 = vpop.xlane.xlu1 %1795 }
0x107e   :  { %v1797_v21 = vsub.f32 %v1787_v47, %v1796_v54 }
0x1080   :  { %v1798_v14 = vmul.f32 1.442695, %v1797_v21 }
0x1082   :  { %3774 = vpow2.f32 %v1798_v14 }
0x108c   :  { %v3775_v55 = vpop.eup %3774 }
0x108d   :  { %v1800_v57 = vsel %vm1793_vm7, %v3775_v55, 0.0 }
0x108e   :  { %1801 = vadd.xlane.f32.xlu0 %v1800_v57 }
0x111b   :  { %v1802_v60 = vpop.xlane.xlu0 %1801 }
0x111c   :  { %3776 = vrcp.f32 %v1802_v60 }
0x1126   :  { %v3777_v61 = vpop.eup %3776 }
0x1127   :  { %v1804_v56 = vmul.f32 %v3777_v61, %v3775_v55 }
0x1129   :  { %v1805_v1 = vpack.c.bf16 %v1804_v56, %v1804_v56 }
0x112b   :  { %3482 = vmatmul.mubr.msk.bf16.vlgmr.msra.gmra.mrb[36].mxu0 %vm1793_vm7, %v1805_v1 }
0x112c   :  { %3502 = vmatpush3.bf16.xpose.msra.mxu0 %v4410_v45  ;;  %3503 = vmatprep.mubr.msk.bf16.mxu0 %vm3867_vm0, %v3866_v18 }
0x112d   :  { %3507 = vmatprep.subr.bf16.mxu0 %v3866_v18 }
0x11fe   :  { %v1849_v3 = vpop.f32.mrb[36].mxu0 }
0x11ff   :  { %v1855_v5 = vpack.c.bf16 %v1849_v3, %v1849_v3  ;;  %v3483_v62 = vpop.f32.mrb[37].mxu0 }
0x1200   :  { %v1852_v6 = vpop.f32.mrb[38].mxu0 }
0x1201   :  { %v3484_v7 = vpop.f32.mrb[39].mxu0  ;;  %3490 = vmatmul.mubr.msk.bf16.vlgmr.msra.gmra.mrb[36].mxu1 %vm806_vm2, %v1855_v5 }
0x1202   :  { %3494 = vmatpush3.bf16.msra.mxu1 %v4446_v4  ;;  %3497 = vmatprep.mubr.msk.bf16.mxu1 %vm3867_vm0, %v3866_v18 }
0x1203   :  { %3495 = vmatprep.subr.bf16.mxu1 %v3866_v18 }
0x1206   :  { %3496 = vmatpush3.bf16.msra.mxu1 %v4453_v63 }
0x1207   :  { %3513 = vmatprep.subr.bf16.mxu1 %v3866_v18 }
0x120d   :  { %3498 = vmatmul.mubr.msk.bf16.vlgmr.msra.gmra.mrb[36].mxu1 %vm806_vm2, %v4360_v59 }
0x120e   :  { %3514 = vmatpush3.bf16.msra.mxu1 %v4427_v58  ;;  %3517 = vmatprep.mubr.msk.bf16.mxu1 %vm3867_vm0, %v3866_v18 }
0x120f   :  { %3515 = vmatprep.subr.bf16.mxu1 %v3866_v18 }
0x1212   :  { %3516 = vmatpush3.bf16.msra.mxu1 %v4439_v2 }
0x1213   :  { %3521 = vmatprep.subr.bf16.mxu1 %v3866_v18 }
0x12e0   :  { %v1958_v10 = vpop.f32.mrb[36].mxu1 }
0x12e1   :  { %v3623_v59 = vadd.f32 %v1958_v10, %v4472_v9  ;;  %v3499_v11 = vpop.f32.mrb[37].mxu1 }
0x12e2   :  { %v1961_v12 = vpop.f32.mrb[38].mxu1 }
0x12e3   :  { %3778 = vtanh.f32 %v3623_v59  ;;  %v3500_v13 = vpop.f32.mrb[39].mxu1  ;;  %v3163_v17 = vmul.f32 -1.442695, %v3623_v59 }
0x12e5   :  { %3780 = vpow2.f32 %v3163_v17 }
0x12ed   :  { %v3779_v16 = vpop.eup %3778 }
0x12ee   :  { %1974 = vrot.lane.b32.xlu0 %v3779_v16, %s3869_s5 }
0x12ef   :  { %v3781_v19 = vpop.eup %3780 }
0x12f0   :  { %v1968_v40 = vadd.f32 1.0, %v3781_v19 }
0x12f2   :  { %1994 = vrot.lane.b32.xlu0 %v4220_v0, %s3872_s2  ;;  %3782 = vrcp.f32 %v1968_v40 }
0x12fc   :  { %v3783_v49 = vpop.eup %3782 }
0x12fd   :  { %v1972_v15 = vmul.f32 0.0, %v3783_v49 }
0x1360   :  { %v1975_v20 = vpop.permute.xlu0 %1974 }
0x1361   :  { %v1977_v22 = vmul.f32 %v3783_v49, %v1975_v20 }
0x1363   :  { %1979 = vrot.lane.b32.xlu1 %v1977_v22, %s3870_s8 }
0x1364   :  { %v4482_v26 = vpop.permute.xlu0 %1994 }
0x13d5   :  { %v1980_v50 = vpop.permute.xlu1 %1979 }
0x13d6   :  { %v4478_v24 = vadd.f32 %v1980_v50, %v1972_v15 }
0x13d8   :  { %3784 = vtanh.f32 %v4478_v24 }
0x13e2   :  { %v3785_v23 = vpop.eup %3784 }
0x13e3   :  { %1985 = vrot.lane.b32.xlu1 %v3785_v23, %s3869_s5 }
0x1455   :  { %v1986_v0 = vpop.permute.xlu1 %1985 }
0x1456   :  { %v1988_v25 = vmul.f32 %v3783_v49, %v1986_v0 }
0x1458   :  { %v1997_v27 = vadd.f32 %v4482_v26, %v1988_v25 }
0x145a   :  { %v1998_v28 = vpack.c.bf16 %v1997_v27, %v1997_v27 }
0x145c   :  { %2000 = vrot.lane.b32.xlu1 %v1998_v28, %s3870_s8 }
0x14ce   :  { %v2001_v29 = vpop.permute.xlu1 %2000 }
0x14cf   :  { %3504 = vmatmul.mubr.msk.bf16.vlgmr.msra.gmra.mrb[40].mxu0 %vm806_vm2, %v2001_v29 }
0x14d0   :  { %3508 = vmatpush3.bf16.msra.mxu0 %v4412_v46  ;;  %3509 = vmatprep.mubr.msk.bf16.mxu0 %vm3867_vm0, %v3866_v18 }
0x14d1   :  { %3529 = vmatprep.subr.bf16.mxu0 %v3866_v18 }
0x15a2   :  { %v2039_v30 = vpop.f32.mrb[40].mxu0 }
0x15a3   :  { %v3505_v31 = vpop.f32.mrb[41].mxu0  ;;  %v2045_v32 = vsel %vm1793_vm7, %v2039_v30, -inf }
0x15a4   :  { %2046 = vmax.xlane.f32.xlu0 %v2045_v32  ;;  %v2042_v33 = vpop.f32.mrb[42].mxu0 }
0x15a5   :  { %v3506_v34 = vpop.f32.mrb[43].mxu0 }
0x1631   :  { %v2047_v35 = vpop.xlane.xlu0 %2046 }
0x1632   :  { %v2048_v36 = vsub.f32 %v2039_v30, %v2047_v35 }
0x1634   :  { %v2049_v37 = vmul.f32 1.442695, %v2048_v36 }
0x1636   :  { %3786 = vpow2.f32 %v2049_v37 }
0x1640   :  { %v3787_v38 = vpop.eup %3786 }
0x1641   :  { %v2051_v39 = vsel %vm1793_vm7, %v3787_v38, 0.0 }
0x1642   :  { %2052 = vadd.xlane.f32.xlu1 %v2051_v39 }
0x16cf   :  { %v2053_v41 = vpop.xlane.xlu1 %2052 }
0x16d0   :  { %3788 = vrcp.f32 %v2053_v41 }
0x16da   :  { %v3789_v43 = vpop.eup %3788 }
0x16db   :  { %v2055_v44 = vmul.f32 %v3789_v43, %v3787_v38 }
0x16dd   :  { %v2056_v47 = vpack.c.bf16 %v2055_v44, %v2055_v44 }
0x16df   :  { %3510 = vmatmul.mubr.msk.bf16.vlgmr.msra.gmra.mrb[44].mxu0 %vm1793_vm7, %v2056_v47 }
0x16e0   :  { %3530 = vmatpush3.bf16.xpose.msra.mxu0 %v4410_v45  ;;  %3531 = vmatprep.mubr.msk.bf16.mxu0 %vm3867_vm0, %v3866_v18 }
0x16e1   :  { %3535 = vmatprep.subr.bf16.mxu0 %v3866_v18 }
0x17b2   :  { %v2094_v48 = vpop.f32.mrb[44].mxu0 }
0x17b3   :  { %v2100_v51 = vpack.c.bf16 %v2094_v48, %v2094_v48  ;;  %v3511_v52 = vpop.f32.mrb[45].mxu0 }
0x17b4   :  { %v2097_v53 = vpop.f32.mrb[46].mxu0 }
0x17b5   :  { %v3512_v54 = vpop.f32.mrb[47].mxu0  ;;  %3518 = vmatmul.mubr.msk.bf16.vlgmr.msra.gmra.mrb[40].mxu1 %vm806_vm2, %v2100_v51 }
0x17b6   :  { %3522 = vmatpush3.bf16.msra.mxu1 %v4446_v4  ;;  %3525 = vmatprep.mubr.msk.bf16.mxu1 %vm3867_vm0, %v3866_v18 }
0x17b7   :  { %3523 = vmatprep.subr.bf16.mxu1 %v3866_v18 }
0x17ba   :  { %3524 = vmatpush3.bf16.msra.mxu1 %v4453_v63 }
0x17bb   :  { %3541 = vmatprep.subr.bf16.mxu1 %v3866_v18 }
0x17c1   :  { %3526 = vmatmul.mubr.msk.bf16.vlgmr.msra.gmra.mrb[40].mxu1 %vm806_vm2, %v2001_v29 }
0x17c2   :  { %3542 = vmatpush3.bf16.msra.mxu1 %v4427_v58  ;;  %3545 = vmatprep.mubr.msk.bf16.mxu1 %vm3867_vm0, %v3866_v18 }
0x17c3   :  { %3543 = vmatprep.subr.bf16.mxu1 %v3866_v18 }
0x17c6   :  { %3544 = vmatpush3.bf16.msra.mxu1 %v4439_v2 }
0x17c7   :  { %3549 = vmatprep.subr.bf16.mxu1 %v3866_v18 }
0x1894   :  { %v2179_v21 = vpop.f32.mrb[40].mxu1 }
0x1895   :  { %v3624_v14 = vadd.f32 %v2179_v21, %v4472_v9  ;;  %v3527_v55 = vpop.f32.mrb[41].mxu1 }
0x1896   :  { %v2182_v57 = vpop.f32.mrb[42].mxu1 }
0x1897   :  { %3790 = vtanh.f32 %v3624_v14  ;;  %v3528_v60 = vpop.f32.mrb[43].mxu1  ;;  %v3168_v56 = vmul.f32 -1.442695, %v3624_v14 }
0x1899   :  { %3792 = vpow2.f32 %v3168_v56 }
0x18a1   :  { %v3791_v61 = vpop.eup %3790 }
0x18a2   :  { %2195 = vrot.lane.b32.xlu0 %v3791_v61, %s3869_s5 }
0x18a3   :  { %v3793_v1 = vpop.eup %3792 }
0x18a4   :  { %v2189_v3 = vadd.f32 1.0, %v3793_v1 }
0x18a6   :  { %3794 = vrcp.f32 %v2189_v3 }
0x18b0   :  { %v3795_v5 = vpop.eup %3794 }
0x18b1   :  { %v2193_v7 = vmul.f32 %v3795_v5, %v4478_v24 }
0x1914   :  { %v2196_v62 = vpop.permute.xlu0 %2195 }
0x1915   :  { %v2198_v6 = vmul.f32 %v3795_v5, %v2196_v62 }
0x1917   :  { %2200 = vrot.lane.b32.xlu1 %v2198_v6, %s3870_s8 }
0x1989   :  { %v2201_v8 = vpop.permute.xlu1 %2200 }
0x198a   :  { %v4516_v10 = vadd.f32 %v2201_v8, %v2193_v7 }
0x198c   :  { %3796 = vtanh.f32 %v4516_v10 }
0x1996   :  { %v3797_v59 = vpop.eup %3796 }
0x1997   :  { %2206 = vrot.lane.b32.xlu0 %v3797_v59, %s3869_s5 }
0x1a09   :  { %v2207_v11 = vpop.permute.xlu0 %2206 }
0x1a0a   :  { %v2209_v12 = vmul.f32 %v3795_v5, %v2207_v11 }
0x1a0c   :  { %v2210_v13 = vadd.f32 %v2209_v12, %v4482_v26 }
0x1a0e   :  { %v2211_v16 = vpack.c.bf16 %v2210_v13, %v2210_v13 }
0x1a10   :  { %2213 = vrot.lane.b32.xlu1 %v2211_v16, %s3870_s8 }
0x1a82   :  { %v2214_v17 = vpop.permute.xlu1 %2213 }
0x1a83   :  { %3532 = vmatmul.mubr.msk.bf16.vlgmr.msra.gmra.mrb[48].mxu0 %vm806_vm2, %v2214_v17 }
0x1a84   :  { %3536 = vmatpush3.bf16.msra.mxu0 %v4412_v46  ;;  %3537 = vmatprep.mubr.msk.bf16.mxu0 %vm3867_vm0, %v3866_v18 }
0x1a85   :  { %3557 = vmatprep.subr.bf16.mxu0 %v3866_v18 }
0x1b56   :  { %v2252_v19 = vpop.f32.mrb[48].mxu0 }
0x1b57   :  { %v3533_v40 = vpop.f32.mrb[49].mxu0  ;;  %v2258_v49 = vsel %vm1793_vm7, %v2252_v19, -inf }
0x1b58   :  { %2259 = vmax.xlane.f32.xlu0 %v2258_v49  ;;  %v2255_v20 = vpop.f32.mrb[50].mxu0 }
0x1b59   :  { %v3534_v22 = vpop.f32.mrb[51].mxu0 }
0x1be5   :  { %v2260_v15 = vpop.xlane.xlu0 %2259 }
0x1be6   :  { %v2261_v50 = vsub.f32 %v2252_v19, %v2260_v15 }
0x1be8   :  { %v2262_v24 = vmul.f32 1.442695, %v2261_v50 }
0x1bea   :  { %3798 = vpow2.f32 %v2262_v24 }
0x1bf4   :  { %v3799_v23 = vpop.eup %3798 }
0x1bf5   :  { %v2264_v0 = vsel %vm1793_vm7, %v3799_v23, 0.0 }
0x1bf6   :  { %2265 = vadd.xlane.f32.xlu1 %v2264_v0 }
0x1c83   :  { %v2266_v25 = vpop.xlane.xlu1 %2265 }
0x1c84   :  { %3800 = vrcp.f32 %v2266_v25 }
0x1c8e   :  { %v3801_v27 = vpop.eup %3800 }
0x1c8f   :  { %v2268_v28 = vmul.f32 %v3801_v27, %v3799_v23 }
0x1c91   :  { %v2269_v29 = vpack.c.bf16 %v2268_v28, %v2268_v28 }
0x1c93   :  { %3538 = vmatmul.mubr.msk.bf16.vlgmr.msra.gmra.mrb[52].mxu0 %vm1793_vm7, %v2269_v29 }
0x1c94   :  { %3558 = vmatpush3.bf16.xpose.msra.mxu0 %v4410_v45  ;;  %3559 = vmatprep.mubr.msk.bf16.mxu0 %vm3867_vm0, %v3866_v18 }
0x1c95   :  { %3563 = vmatprep.subr.bf16.mxu0 %v3866_v18 }
0x1d66   :  { %v2307_v30 = vpop.f32.mrb[52].mxu0 }
0x1d67   :  { %v2313_v31 = vpack.c.bf16 %v2307_v30, %v2307_v30  ;;  %v3539_v32 = vpop.f32.mrb[53].mxu0 }
0x1d68   :  { %v2310_v33 = vpop.f32.mrb[54].mxu0 }
0x1d69   :  { %v3540_v34 = vpop.f32.mrb[55].mxu0  ;;  %3546 = vmatmul.mubr.msk.bf16.vlgmr.msra.gmra.mrb[44].mxu1 %vm806_vm2, %v2313_v31 }
0x1d6a   :  { %3550 = vmatpush3.bf16.msra.mxu1 %v4446_v4  ;;  %3553 = vmatprep.mubr.msk.bf16.mxu1 %vm3867_vm0, %v3866_v18 }
0x1d6b   :  { %3551 = vmatprep.subr.bf16.mxu1 %v3866_v18 }
0x1d6e   :  { %3552 = vmatpush3.bf16.msra.mxu1 %v4453_v63 }
0x1d6f   :  { %3569 = vmatprep.subr.bf16.mxu1 %v3866_v18 }
0x1d75   :  { %3554 = vmatmul.mubr.msk.bf16.vlgmr.msra.gmra.mrb[44].mxu1 %vm806_vm2, %v2214_v17 }
0x1d76   :  { %3570 = vmatpush3.bf16.msra.mxu1 %v4427_v58  ;;  %3573 = vmatprep.mubr.msk.bf16.mxu1 %vm3867_vm0, %v3866_v18 }
0x1d77   :  { %3571 = vmatprep.subr.bf16.mxu1 %v3866_v18 }
0x1d7a   :  { %3572 = vmatpush3.bf16.msra.mxu1 %v4439_v2 }
0x1d7b   :  { %3577 = vmatprep.subr.bf16.mxu1 %v3866_v18 }
0x1e48   :  { %v2392_v35 = vpop.f32.mrb[44].mxu1 }
0x1e49   :  { %v3625_v36 = vadd.f32 %v2392_v35, %v4472_v9  ;;  %v3555_v37 = vpop.f32.mrb[45].mxu1 }
0x1e4a   :  { %v2395_v38 = vpop.f32.mrb[46].mxu1 }
0x1e4b   :  { %3802 = vtanh.f32 %v3625_v36  ;;  %v3556_v39 = vpop.f32.mrb[47].mxu1  ;;  %v3173_v43 = vmul.f32 -1.442695, %v3625_v36 }
0x1e4d   :  { %3804 = vpow2.f32 %v3173_v43 }
0x1e55   :  { %v3803_v41 = vpop.eup %3802 }
0x1e56   :  { %2408 = vrot.lane.b32.xlu0 %v3803_v41, %s3869_s5 }
0x1e57   :  { %v3805_v44 = vpop.eup %3804 }
0x1e58   :  { %v2402_v47 = vadd.f32 1.0, %v3805_v44 }
0x1e5a   :  { %3806 = vrcp.f32 %v2402_v47 }
0x1e64   :  { %v3807_v48 = vpop.eup %3806 }
0x1e65   :  { %v2406_v53 = vmul.f32 %v3807_v48, %v4516_v10 }
0x1ec8   :  { %v2409_v51 = vpop.permute.xlu0 %2408 }
0x1ec9   :  { %v2411_v52 = vmul.f32 %v3807_v48, %v2409_v51 }
0x1ecb   :  { %2413 = vrot.lane.b32.xlu1 %v2411_v52, %s3870_s8 }
0x1f3d   :  { %v2414_v54 = vpop.permute.xlu1 %2413 }
0x1f3e   :  { %v4552_v21 = vadd.f32 %v2414_v54, %v2406_v53 }
0x1f40   :  { %3808 = vtanh.f32 %v4552_v21 }
0x1f4a   :  { %v3809_v14 = vpop.eup %3808 }
0x1f4b   :  { %2419 = vrot.lane.b32.xlu0 %v3809_v14, %s3869_s5 }
0x1fbd   :  { %v2420_v55 = vpop.permute.xlu0 %2419 }
0x1fbe   :  { %v2422_v57 = vmul.f32 %v3807_v48, %v2420_v55 }
0x1fc0   :  { %v2423_v60 = vadd.f32 %v2422_v57, %v4482_v26 }
0x1fc2   :  { %v2424_v61 = vpack.c.bf16 %v2423_v60, %v2423_v60 }
0x1fc4   :  { %2426 = vrot.lane.b32.xlu1 %v2424_v61, %s3870_s8 }
0x2036   :  { %v2427_v56 = vpop.permute.xlu1 %2426 }
0x2037   :  { %3560 = vmatmul.mubr.msk.bf16.vlgmr.msra.gmra.mrb[56].mxu0 %vm806_vm2, %v2427_v56 }
0x2038   :  { %3564 = vmatpush3.bf16.msra.mxu0 %v4412_v46  ;;  %3565 = vmatprep.mubr.msk.bf16.mxu0 %vm3867_vm0, %v3866_v18 }
0x2039   :  { %3585 = vmatprep.subr.bf16.mxu0 %v3866_v18 }
0x210a   :  { %v2465_v1 = vpop.f32.mrb[56].mxu0 }
0x210b   :  { %v3561_v3 = vpop.f32.mrb[57].mxu0  ;;  %v2471_v5 = vsel %vm1793_vm7, %v2465_v1, -inf }
0x210c   :  { %2472 = vmax.xlane.f32.xlu0 %v2471_v5  ;;  %v2468_v62 = vpop.f32.mrb[58].mxu0 }
0x210d   :  { %v3562_v6 = vpop.f32.mrb[59].mxu0 }
0x2199   :  { %v2473_v7 = vpop.xlane.xlu0 %2472 }
0x219a   :  { %v2474_v8 = vsub.f32 %v2465_v1, %v2473_v7 }
0x219c   :  { %v2475_v10 = vmul.f32 1.442695, %v2474_v8 }
0x219e   :  { %3810 = vpow2.f32 %v2475_v10 }
0x21a8   :  { %v3811_v59 = vpop.eup %3810 }
0x21a9   :  { %v2477_v11 = vsel %vm1793_vm7, %v3811_v59, 0.0 }
0x21aa   :  { %2478 = vadd.xlane.f32.xlu1 %v2477_v11 }
0x2237   :  { %v2479_v12 = vpop.xlane.xlu1 %2478 }
0x2238   :  { %3812 = vrcp.f32 %v2479_v12 }
0x2242   :  { %v3813_v13 = vpop.eup %3812 }
0x2243   :  { %v2481_v16 = vmul.f32 %v3813_v13, %v3811_v59 }
0x2245   :  { %v2482_v17 = vpack.c.bf16 %v2481_v16, %v2481_v16 }
0x2247   :  { %3566 = vmatmul.mubr.msk.bf16.vlgmr.msra.gmra.mrb[60].mxu0 %vm1793_vm7, %v2482_v17 }
0x2248   :  { %3586 = vmatpush3.bf16.xpose.msra.mxu0 %v4410_v45  ;;  %3587 = vmatprep.mubr.msk.bf16.mxu0 %vm3867_vm0, %v3866_v18 }
0x2249   :  { %3591 = vmatprep.subr.bf16.mxu0 %v3866_v18 }
0x231a   :  { %v2520_v19 = vpop.f32.mrb[60].mxu0 }
0x231b   :  { %v2526_v40 = vpack.c.bf16 %v2520_v19, %v2520_v19  ;;  %v3567_v49 = vpop.f32.mrb[61].mxu0 }
0x231c   :  { %v2523_v20 = vpop.f32.mrb[62].mxu0 }
0x231d   :  { %v3568_v22 = vpop.f32.mrb[63].mxu0  ;;  %3574 = vmatmul.mubr.msk.bf16.vlgmr.msra.gmra.mrb[48].mxu1 %vm806_vm2, %v2526_v40 }
0x231e   :  { %3578 = vmatpush3.bf16.msra.mxu1 %v4446_v4  ;;  %3581 = vmatprep.mubr.msk.bf16.mxu1 %vm3867_vm0, %v3866_v18  ;;  %v2867_v22 = vmul.f32 %v4404_v42, %v4404_v42 }
0x231f   :  { %3579 = vmatprep.subr.bf16.mxu1 %v3866_v18 }
0x2322   :  { %3580 = vmatpush3.bf16.msra.mxu1 %v4453_v63 }
0x2323   :  { %3597 = vmatprep.subr.bf16.mxu1 %v3866_v18 }
0x2329   :  { %3582 = vmatmul.mubr.msk.bf16.vlgmr.msra.gmra.mrb[48].mxu1 %vm806_vm2, %v2427_v56 }
0x232a   :  { %3598 = vmatpush3.bf16.msra.mxu1 %v4427_v58  ;;  %3601 = vmatprep.mubr.msk.bf16.mxu1 %vm3867_vm0, %v3866_v18 }
0x232b   :  { %3599 = vmatprep.subr.bf16.mxu1 %v3866_v18 }
0x232e   :  { %3600 = vmatpush3.bf16.msra.mxu1 %v4439_v2 }
0x232f   :  { %3605 = vmatprep.subr.bf16.mxu1 %v3866_v18 }
0x23fc   :  { %v2605_v45 = vpop.f32.mrb[48].mxu1 }
0x23fd   :  { %v3626_v15 = vadd.f32 %v2605_v45, %v4472_v9  ;;  %v3583_v50 = vpop.f32.mrb[49].mxu1  ;;  %v2868_v45 = vsel %vm921_vm1, %v2867_v22, 0.0 }
0x23fe   :  { %v2608_v24 = vpop.f32.mrb[50].mxu1 }
0x23ff   :  { %3814 = vtanh.f32 %v3626_v15  ;;  %v3584_v23 = vpop.f32.mrb[51].mxu1  ;;  %v3178_v58 = vmul.f32 -1.442695, %v3626_v15 }
0x2401   :  { %3816 = vpow2.f32 %v3178_v58 }
0x2409   :  { %v3815_v0 = vpop.eup %3814 }
0x240a   :  { %2621 = vrot.lane.b32.xlu0 %v3815_v0, %s3869_s5 }
0x240b   :  { %v3817_v25 = vpop.eup %3816 }
0x240c   :  { %v2615_v27 = vadd.f32 1.0, %v3817_v25 }
0x240e   :  { %3818 = vrcp.f32 %v2615_v27 }
0x2418   :  { %v3819_v28 = vpop.eup %3818 }
0x2419   :  { %v2619_v30 = vmul.f32 %v3819_v28, %v4552_v21 }
0x247c   :  { %v2622_v29 = vpop.permute.xlu0 %2621 }
0x247d   :  { %v2624_v2 = vmul.f32 %v3819_v28, %v2622_v29 }
0x247f   :  { %2626 = vrot.lane.b32.xlu1 %v2624_v2, %s3870_s8 }
0x24f1   :  { %v2627_v31 = vpop.permute.xlu1 %2626 }
0x24f2   :  { %v2629_v32 = vadd.f32 %v2627_v31, %v2619_v30 }
0x24f4   :  { %3820 = vtanh.f32 %v2629_v32 }
0x24fe   :  { %v3821_v33 = vpop.eup %3820 }
0x24ff   :  { %2632 = vrot.lane.b32.xlu0 %v3821_v33, %s3869_s5 }
0x2571   :  { %v2633_v34 = vpop.permute.xlu0 %2632 }
0x2572   :  { %v2635_v35 = vmul.f32 %v3819_v28, %v2633_v34 }
0x2574   :  { %v2636_v36 = vadd.f32 %v2635_v35, %v4482_v26 }
0x2576   :  { %v2637_v37 = vpack.c.bf16 %v2636_v36, %v2636_v36 }
0x2578   :  { %2639 = vrot.lane.b32.xlu1 %v2637_v37, %s3870_s8 }
0x25ea   :  { %v2640_v38 = vpop.permute.xlu1 %2639 }
0x25eb   :  { %3588 = vmatmul.mubr.msk.bf16.vlgmr.msra.gmra.mrb[64].mxu0 %vm806_vm2, %v2640_v38 }
0x25ec   :  { %3592 = vmatpush3.bf16.msra.mxu0 %v4412_v46  ;;  %3593 = vmatprep.mubr.msk.bf16.mxu0 %vm3867_vm0, %v3866_v18 }
0x25ed   :  { %3613 = vmatprep.subr.mxu0 %v3866_v18 }
0x26be   :  { %v2678_v39 = vpop.f32.mrb[64].mxu0 }
0x26bf   :  { %v3589_v41 = vpop.f32.mrb[65].mxu0  ;;  %v2684_v43 = vsel %vm1793_vm7, %v2678_v39, -inf }
0x26c0   :  { %2685 = vmax.xlane.f32.xlu0 %v2684_v43  ;;  %v2681_v44 = vpop.f32.mrb[66].mxu0 }
0x26c1   :  { %v3590_v47 = vpop.f32.mrb[67].mxu0 }
0x274d   :  { %v2686_v48 = vpop.xlane.xlu0 %2685 }
0x274e   :  { %v2687_v51 = vsub.f32 %v2678_v39, %v2686_v48 }
0x2750   :  { %v2688_v52 = vmul.f32 1.442695, %v2687_v51 }
0x2752   :  { %3822 = vpow2.f32 %v2688_v52 }
0x275c   :  { %v3823_v53 = vpop.eup %3822 }
0x275d   :  { %v2690_v54 = vsel %vm1793_vm7, %v3823_v53, 0.0 }
0x275e   :  { %2691 = vadd.xlane.f32.xlu1 %v2690_v54 }
0x27eb   :  { %v2692_v46 = vpop.xlane.xlu1 %2691 }
0x27ec   :  { %3824 = vrcp.f32 %v2692_v46 }
0x27f6   :  { %v3825_v21 = vpop.eup %3824 }
0x27f7   :  { %v2694_v14 = vmul.f32 %v3825_v21, %v3823_v53 }
0x27f9   :  { %v2695_v55 = vpack.c.bf16 %v2694_v14, %v2694_v14 }
0x27fb   :  { %3594 = vmatmul.mubr.msk.bf16.vlgmr.msra.gmra.mrb[68].mxu0 %vm1793_vm7, %v2695_v55 }
0x27fc   :  { %3615 = vmatprep.mubr.msk.f32.mxu0 %vm3867_vm0, %v3866_v18 }
0x28ce   :  { %v2733_v57 = vpop.f32.mrb[68].mxu0 }
0x28cf   :  { %v2739_v60 = vpack.c.bf16 %v2733_v57, %v2733_v57  ;;  %v3595_v61 = vpop.f32.mrb[69].mxu0 }
0x28d0   :  { %v2736_v56 = vpop.f32.mrb[70].mxu0 }
0x28d1   :  { %v3596_v1 = vpop.f32.mrb[71].mxu0  ;;  %3602 = vmatmul.mubr.msk.bf16.vlgmr.msra.gmra.mrb[52].mxu1 %vm806_vm2, %v2739_v60 }
0x28d2   :  { %3606 = vmatpush3.bf16.msra.mxu1 %v4446_v4  ;;  %3609 = vmatprep.mubr.msk.bf16.mxu1 %vm3867_vm0, %v3866_v18 }
0x28d3   :  { %3607 = vmatprep.subr.bf16.mxu1 %v3866_v18 }
0x28d6   :  { %3608 = vmatpush3.bf16.msra.mxu1 %v4453_v63 }
0x28dd   :  { %3610 = vmatmul.mubr.msk.bf16.vlgmr.msra.gmra.mrb[52].mxu1 %vm806_vm2, %v2640_v38 }
0x29b0   :  { %v2818_v3 = vpop.f32.mrb[52].mxu1 }
0x29b1   :  { %v3627_v5 = vadd.f32 %v2818_v3, %v4472_v9  ;;  %v3611_v62 = vpop.f32.mrb[53].mxu1 }
0x29b2   :  { %v2821_v6 = vpop.f32.mrb[54].mxu1 }
0x29b3   :  { %3826 = vtanh.f32 %v3627_v5  ;;  %v3612_v7 = vpop.f32.mrb[55].mxu1  ;;  %v3183_v4 = vmul.f32 -1.442695, %v3627_v5 }
0x29b5   :  { %3828 = vpow2.f32 %v3183_v4 }
0x29bd   :  { %v3827_v8 = vpop.eup %3826 }
0x29be   :  { %2834 = vrot.lane.b32.xlu0 %v3827_v8, %s3869_s5 }
0x29bf   :  { %v3829_v10 = vpop.eup %3828 }
0x29c0   :  { %v2828_v59 = vadd.f32 1.0, %v3829_v10 }
0x29c2   :  { %3830 = vrcp.f32 %v2828_v59 }
0x29cc   :  { %v3831_v11 = vpop.eup %3830 }
0x29cd   :  { %v2832_v13 = vmul.f32 %v3831_v11, %v2629_v32 }
0x2a30   :  { %v2835_v12 = vpop.permute.xlu0 %2834 }
0x2a31   :  { %v2837_v63 = vmul.f32 %v3831_v11, %v2835_v12 }
0x2a33   :  { %2839 = vrot.lane.b32.xlu1 %v2837_v63, %s3870_s8 }
0x2aa5   :  { %v2840_v16 = vpop.permute.xlu1 %2839 }
0x2aa6   :  { %v2842_v9 = vadd.f32 %v2840_v16, %v2832_v13 }
0x2aa8   :  { %3832 = vtanh.f32 %v2842_v9 }
0x2ab2   :  { %v3833_v17 = vpop.eup %3832 }
0x2ab3   :  { %2845 = vrot.lane.b32.xlu0 %v3833_v17, %s3869_s5 }
0x2b25   :  { %v2846_v19 = vpop.permute.xlu0 %2845 }
0x2b26   :  { %v2848_v40 = vmul.f32 %v3831_v11, %v2846_v19 }
0x2b28   :  { %v2849_v49 = vadd.f32 %v2848_v40, %v4482_v26 }
0x2b2a   :  { %v2850_v20 = vmul.f32 %v2849_v49, %v2849_v49 }
0x2b2c   :  { %2852 = vrot.lane.b32.xlu1 %v2850_v20, %s3870_s8 }
0x2b50   :  { %2869 = vadd.xlane.f32.xlu1 %v2868_v45 }
0x2b9e   :  { %v2853_v15 = vpop.permute.xlu1 %2852 }
0x2b9f   :  { %v2855_v50 = vsel %vm806_vm2, %v2853_v15, 0.0 }
0x2ba0   :  { %2856 = vadd.xlane.f32.xlu0 %v2855_v50 }
0x2bdd   :  { %v2870_v24 = vpop.xlane.xlu1 %2869 }
0x2bde   :  { %3834 = vrsqrt.f32 %v2870_v24  ;;  %vm2873_vm8 = vcmp.eq.f32.partialorder %v2870_v24, inf  ;;  %v2876_v58 = vand.u32 2147483648, %v2870_v24  ;;  %vm2875_vm9 = vcmp.eq.f32.partialorder %v2870_v24, 0.0 }
0x2be8   :  { %v3835_v23 = vpop.eup %3834 }
0x2be9   :  { %v2872_v0 = vmul.f32 %v3835_v23, %v2870_v24 }
0x2beb   :  { %v2874_v26 = vsel %vm2873_vm8, %v2870_v24, %v2872_v0 }
0x2bec   :  { %v2877_v25 = vsel %vm2875_vm9, %v2876_v58, %v2874_v26 }
0x2bed   :  { %v2878_v27 = vmax.f32 %v2877_v25, 1e-12 }
0x2bef   :  { %3836 = vrcp.f32 %v2878_v27 }
0x2bf9   :  { %v3837_v28 = vpop.eup %3836 }
0x2bfa   :  { %v2881_v29 = vmul.f32 %v3837_v28, %v4404_v42  ;;  %v2960_v42 = vld [vmem:[%s4655_s13] sm:$0x1f]  ;;  %s3842_s13 = scalar_lea.vmem %s3046_s21, 128 }
0x2bfb   :  { %p3843_p0 = scmp.ne.s32.totalorder %s3046_s21, %s3842_s13  ;;  %p3848_p2 = scmp.lt.s32.totalorder %s3842_s13, %s3842_s13 }
0x2bfc   :  { %3614 = vmatpush3.xpose.msk.msra.mxu0 %vm806_vm2, %v2881_v29 }
0x2bfd   :  { %3618 = vmatprep.subr.mxu0 %v3866_v18  ;;  %p3849_p3 = por %p3848_p2, %p3847_p1 }
0x2bff   :  { %p3850_p4 = pnand %p3849_p3, %p3843_p0 }
0x2c2d   :  { %v2857_v2 = vpop.xlane.xlu0 %2856 }
0x2c2e   :  { %3838 = vrsqrt.f32 %v2857_v2  ;;  %vm2860_vm10 = vcmp.eq.f32.partialorder %v2857_v2, inf  ;;  %v2863_v32 = vand.u32 2147483648, %v2857_v2  ;;  %vm2862_vm11 = vcmp.eq.f32.partialorder %v2857_v2, 0.0 }
0x2c38   :  { %v3839_v30 = vpop.eup %3838 }
0x2c39   :  { %v2859_v31 = vmul.f32 %v3839_v30, %v2857_v2 }
0x2c3b   :  { %v2861_v33 = vsel %vm2860_vm10, %v2857_v2, %v2859_v31 }
0x2c3c   :  { %v2864_v34 = vsel %vm2862_vm11, %v2863_v32, %v2861_v33 }
0x2c3d   :  { %v2865_v35 = vmax.f32 %v2864_v34, 1e-12 }
0x2c3f   :  { %3840 = vrcp.f32 %v2865_v35 }
0x2c49   :  { %v3841_v36 = vpop.eup %3840 }
0x2c4a   :  { %v2880_v37 = vmul.f32 %v3841_v36, %v2849_v49 }
0x2c4c   :  { %2883 = vrot.lane.b32.xlu0 %v2880_v37, %s3870_s8 }
0x2cbe   :  { %v2884_v38 = vpop.permute.xlu0 %2883 }
0x2cbf   :  { %3616 = vmatmul.mubr.msk.f32.vlgmr.msra.gmra.mrb[72].mxu0 %vm806_vm2, %v2884_v38 }
0x2cc0   :  { %3619 = vmatpush3.msk.msra.mxu0 %vm2964_vm12, %v2960_v42  ;;  %3620 = vmatprep.mubr.msk.f32.mxu0 %vm3867_vm0, %v3866_v18 }
0x2d92   :  { %v2956_v39 = vpop.f32.mrb[72].mxu0 }
0x2d93   :  { %v3617_v41 = vpop.f32.mrb[73].mxu0  ;;  %3621 = vmatmul.mubr.msk.f32.vlgmr.msra.gmra.mrb[74].mxu0 %vm1793_vm7, %v2956_v39 }
0x2e66   :  { %v3034_v43 = vpop.f32.mrb[74].mxu0 }
0x2e67   :  { %3038 = vst.msk [vmem:[#allocation3] sm:$0xff] %vm1793_vm7, %v3034_v43  ;;  %v3622_v44 = vpop.f32.mrb[75].mxu0 }
0x2e68   :  { %3853 = shalt.err (!%p3850_p4)
}
0x2e69   :  { %s3854_s24 = scalar_lea.hbm %s4656_s14, 128 }
0x2e6a   :  { %p3855_p5 = scmp.ne.s32.totalorder %s4656_s14, %s3854_s24  ;;  %p3858_p6 = scmp.lt.u32.totalorder %s3854_s24, %s4656_s14 }
0x2e6c   :  { %p3860_p7 = pnand %p3858_p6, %p3855_p5 }
0x2e6e   :  { %3863 = shalt.err (!%p3860_p7)
}
0x2e6f   :  { %3048 = dma.vmem_to_hbm [thread:$0]  %s3046_s21, 128, %s4656_s14, [#allocation4]  }
0x2e70   :  { %3864 = dma.done.wait [#allocation4], 128  }
0x2e71   :  { %3865 = vsyncadd [#allocation4], 4294967168 }
0x2e72   :  { %3052 = vsyncpa [#allocation4], 1 }

</bundles_post_ra>
